<compile_context>
chip_gen: v5e
topology: v5e:2x2
jax: 0.10.0
libtpu: 0.0.40
codegen_flags: <defaults>
</compile_context>

<pallas_src>
import functools
import math

import jax
import jax.numpy as jnp
from jax.experimental import pallas as pl
from jax.experimental.pallas import tpu as pltpu


def _round_up(x, m):
    return (x + m - 1) // m * m


# ----------------------- fused 3x3 conv + BN + ReLU kernel -----------------------
#
# The activation is pre-padded spatially (pad=1) and flattened to rows of the
# padded grid: row(n, i, j) = n*(H+2)*(W+2) + i*(W+2) + j.  For output pixel
# (n, h, w) the tap (kh, kw) reads flat row  base(n,h,w) + kh*(W+2) + kw, so
# every tap is a constant row-offset slice of the same VMEM block.  We compute
# all rows of the padded grid (a few % extra work) and discard the border rows
# on the host with a cheap strided slice.

def _conv3x3_kernel(x_ref, w_ref, shift_ref, o_ref, *, row_stride):
    tm = o_ref.shape[0]
    base = pl.multiple_of(pl.program_id(0) * tm, 8)
    acc = jnp.zeros((tm, o_ref.shape[1]), jnp.float32)
    for kh in range(3):
        for kw in range(3):
            d = kh * row_stride + kw
            xs = x_ref[pl.ds(base + d, tm), :].astype(jnp.bfloat16)
            acc = acc + jnp.dot(xs, w_ref[kh * 3 + kw],
                                preferred_element_type=jnp.float32)
    y = acc + shift_ref[...]                 # BN scale already folded into w
    o_ref[...] = jnp.maximum(y, 0.0).astype(o_ref.dtype)


def conv3x3_bn_relu(x_nhwc, w9, shift, *, tm_max=128):
    """x: (N,H,W,Cin_p) f32, w9: (9,Cin_p,Cout_p) bf16 (BN-folded), shift: (1,Cout_p)."""
    n, h, w, cin_p = x_nhwc.shape
    taps, cin_p2, cout_p = w9.shape
    assert taps == 9 and cin_p2 == cin_p

    hp, wp = h + 2, w + 2
    row_stride = wp
    xpad = jnp.pad(x_nhwc.astype(jnp.float32), ((0, 0), (1, 1), (1, 1), (0, 0)))

    mo = n * hp * wp                               # rows of the padded grid
    tm = min(tm_max, _round_up(mo, 8))
    mo_p = _round_up(mo, tm)
    d_max = 2 * row_stride + 2                     # largest tap offset
    mtot = _round_up(mo_p + d_max, 8)              # halo rows for the last tile

    xf = xpad.reshape(mo, cin_p)
    xf = jnp.pad(xf, ((0, mtot - mo), (0, 0)))

    kernel = functools.partial(_conv3x3_kernel, row_stride=row_stride)
    out = pl.pallas_call(
        kernel,
        out_shape=jax.ShapeDtypeStruct((mo_p, cout_p), jnp.float32),
        grid_spec=pltpu.PrefetchScalarGridSpec(
            num_scalar_prefetch=0,
            grid=(mo_p // tm,),
            in_specs=[
                pl.BlockSpec((mtot, cin_p), lambda i: (0, 0)),       # whole act, fetched once
                pl.BlockSpec((9, cin_p, cout_p), lambda i: (0, 0, 0)),
                pl.BlockSpec((1, cout_p), lambda i: (0, 0)),
            ],
            out_specs=pl.BlockSpec((tm, cout_p), lambda i: (i, 0)),
        ),
        compiler_params=pltpu.CompilerParams(
            dimension_semantics=("parallel",),       # v7x: M tiles shard across TCs
            vmem_limit_bytes=32 * 1024 * 1024,
        ),
    )(xf, w9, shift)

    out = out[:mo].reshape(n, hp, wp, cout_p)[:, :h, :w, :]
    return out


# ------------------- single-step fused matmul (final conv + FC) -------------------

def _matmul_kernel(x_ref, w_ref, shift_ref, o_ref, *, relu):
    y = jnp.dot(x_ref[...], w_ref[...], preferred_element_type=jnp.float32)
    y = y + shift_ref[...]
    if relu:
        y = jnp.maximum(y, 0.0)
    o_ref[...] = y.astype(o_ref.dtype)


def fused_matmul(x, w_p, shift_p, n_out, *, relu, out_dtype, tm_max=256, tn_max=512):
    """out = act(x @ w_p + shift_p)[:, :n_out]; w_p/shift_p are pre-padded bf16/f32."""
    M, K = x.shape
    Kp, Np = w_p.shape
    assert K <= Kp and Kp % 128 == 0 and Np % 128 == 0

    tm = min(tm_max, _round_up(M, 16))             # 16 rows per bf16 vreg group
    Mp = _round_up(M, tm)
    tn = min(tn_max, Np)
    while Np % tn:
        tn -= 128

    xp = jnp.pad(x.astype(jnp.bfloat16), ((0, Mp - M), (0, Kp - K)))

    out = pl.pallas_call(
        functools.partial(_matmul_kernel, relu=relu),
        out_shape=jax.ShapeDtypeStruct((Mp, Np), out_dtype),
        grid_spec=pltpu.PrefetchScalarGridSpec(
            num_scalar_prefetch=0,
            grid=(Mp // tm, Np // tn),                   # single K step: K == Kp
            in_specs=[
                pl.BlockSpec((tm, Kp), lambda i, j: (i, 0)),
                pl.BlockSpec((Kp, tn), lambda i, j: (0, j)),
                pl.BlockSpec((1, tn), lambda i, j: (0, j)),
            ],
            out_specs=pl.BlockSpec((tm, tn), lambda i, j: (i, j)),
        ),
        compiler_params=pltpu.CompilerParams(
            dimension_semantics=("parallel", "parallel"),
            vmem_limit_bytes=32 * 1024 * 1024,
        ),
    )(xp, w_p, shift_p)
    return out[:M, :n_out]


# ----------------------------------- Glue (JAX) -----------------------------------

def maxpool2x2(x_nhwc):
    n, h, w, c = x_nhwc.shape
    x = x_nhwc.reshape(n, h // 2, 2, w // 2, 2, c)
    return x.max(axis=(2, 4))


# ----------------------------------- VGG model ------------------------------------

# Small VGG-style feature config (conv3x3 + BN + ReLU, 'M' = maxpool 2x2), chosen
# so the flattened feature size is exactly 512 = nn.Linear(512, num_classes) input.
CFG = [16, "M", 32, "M", 64, "M", 128, "M", 512]
NUM_CLASSES = 10


def init_params(key, in_channels=3, num_classes=NUM_CLASSES):
    """Deterministic init mirroring VGG._initialize_weights()."""
    convs, bns = [], []
    c = in_channels
    for v in CFG:
        if v == "M":
            continue
        key, k1 = jax.random.split(key)
        std = math.sqrt(2.0 / (3 * 3 * v))          # n = kh*kw*out_channels
        w = jax.random.normal(k1, (3, 3, c, v), jnp.float32) * std
        b = jnp.zeros((v,), jnp.float32)
        convs.append((w, b))
        # BatchNorm2d: gamma=1, beta=0, running_mean=0, running_var=1
        bns.append((jnp.ones((v,), jnp.float32), jnp.zeros((v,), jnp.float32),
                    jnp.zeros((v,), jnp.float32), jnp.ones((v,), jnp.float32)))
        c = v
    key, k1 = jax.random.split(key)
    fc_w = jax.random.normal(k1, (num_classes, 512), jnp.float32) * 0.01
    fc_b = jnp.zeros((num_classes,), jnp.float32)
    return {"convs": convs, "bns": bns, "fc": (fc_w, fc_b)}


def prepare_params(params, eps=1e-5):
    """One-time operand prep: fold BN scale into weights (f32), cast bf16, pad."""
    convs = []
    last_cout = None
    for (w, b), (gamma, beta, mean, var) in zip(params["convs"], params["bns"]):
        _, _, cin, cout = w.shape
        scale = gamma / jnp.sqrt(var + eps)                    # BN -> affine
        shift = beta + (b - mean) * scale                      # conv bias folded in
        wf = (w * scale).astype(jnp.bfloat16)                  # fold in f32, cast once
        cin_p, cout_p = _round_up(cin, 128), _round_up(cout, 128)
        wp = jnp.pad(wf, ((0, 0), (0, 0), (0, cin_p - cin), (0, cout_p - cout)))
        w9 = wp.reshape(9, cin_p, cout_p)                      # (kh*3+kw, cin, cout)
        shift_p = jnp.pad(shift.astype(jnp.float32), (0, cout_p - cout)).reshape(1, cout_p)
        convs.append({"w9": w9, "shift": shift_p, "cout": cout})
        last_cout = cout
    fc_w, fc_b = params["fc"]
    nclass, dim = fc_w.shape
    np_, kp = _round_up(nclass, 128), _round_up(dim, 128)
    fc_wp = jnp.pad(fc_w.T.astype(jnp.bfloat16), ((0, kp - dim), (0, np_ - nclass)))
    fc_shift = jnp.pad(fc_b.astype(jnp.float32), (0, np_ - nclass)).reshape(1, np_)
    return {"convs": convs, "fc": {"w": fc_wp, "shift": fc_shift, "n": nclass},
            "last_cout": last_cout}


def vgg_forward(prepared, x_nchw):
    """Forward pass matching VGG.forward: features -> flatten -> classifier."""
    x = jnp.transpose(x_nchw, (0, 2, 3, 1)).astype(jnp.float32)    # NCHW -> NHWC
    cin = x.shape[-1]
    cin_p = _round_up(cin, 128)
    if cin_p > cin:                                                # lane-dense channels
        x = jnp.pad(x, ((0, 0), (0, 0), (0, 0), (0, cin_p - cin)))

    ci = 0
    for v in CFG:
        if v == "M":
            x = maxpool2x2(x)
        else:
            layer = prepared["convs"][ci]
            ci += 1
            if x.shape[1] == 1 and x.shape[2] == 1:
                # 1x1 spatial input: only the centre tap sees non-zero data.
                n = x.shape[0]
                xf = x.reshape(n, -1)
                y = fused_matmul(xf, layer["w9"][4], layer["shift"], layer["cout"],
                                 relu=True, out_dtype=jnp.float32)
                x = y.reshape(n, 1, 1, layer["cout"])
            else:
                x = conv3x3_bn_relu(x, layer["w9"], layer["shift"])

    n = x.shape[0]
    # Final spatial is 1x1, so NHWC flatten == NCHW flatten (torch .view order).
    feats = x[..., :prepared["last_cout"]].reshape(n, -1)          # (N, 512)
    fc = prepared["fc"]
    logits = fused_matmul(feats, fc["w"], fc["shift"], fc["n"],
                          relu=False, out_dtype=jnp.float32)
    return logits


# --------------------------------------- Main ---------------------------------------

if __name__ == "__main__":
    key = jax.random.PRNGKey(0)
    key, pkey, xkey = jax.random.split(key, 3)
    params = init_params(pkey)
    prepared = prepare_params(params)
    # Small CIFAR-like input: batch=2, channels=3, spatial=16x16 (NCHW).
    x = jax.random.normal(xkey, (2, 3, 16, 16), jnp.float32)
    logits = vgg_forward(prepared, x)
    jax.block_until_ready(logits)
    assert logits.shape == (2, NUM_CLASSES), logits.shape
    print("KERNEL_OK")
</pallas_src>

<mosaic_0001>
module attributes {stable_mosaic.version = 11 : i64} {
  func.func @_conv3x3_kernel(%arg0: i32, %arg1: memref<808x128xf32, #tpu.memory_space<vmem>>, %arg2: memref<9x128x128xbf16, #tpu.memory_space<vmem>>, %arg3: memref<1x128xf32, #tpu.memory_space<vmem>>, %arg4: memref<128x128xf32, #tpu.memory_space<vmem>>) attributes {dimension_semantics = [#tpu.dimension_semantics<parallel>], iteration_bounds = array<i64: 6>, scalar_prefetch = 0 : i64, scratch_operands = 0 : i64, tpu.core_type = #tpu.core_type<tc>, window_params = [{pipeline_mode = #tpu.pipeline_mode<synchronous>, transform_indices = @transform_0, window_bounds = array<i64: 808, 128>}, {pipeline_mode = #tpu.pipeline_mode<synchronous>, transform_indices = @transform_1, window_bounds = array<i64: 9, 128, 128>}, {pipeline_mode = #tpu.pipeline_mode<synchronous>, transform_indices = @transform_2, window_bounds = array<i64: 1, 128>}, {transform_indices = @transform_3, window_bounds = array<i64: 128, 128>}]} {
    %c128_i32 = arith.constant 128 : i32
    %0 = arith.muli %arg0, %c128_i32 : i32
    %1 = tpu.assume_multiple %0, 8 : i32
    %cst = arith.constant 0.000000e+00 : f32
    %2 = vector.broadcast %cst : f32 to vector<128x128xf32>
    %c0_i32 = arith.constant 0 : i32
    %3 = arith.addi %1, %c0_i32 : i32
    %4 = arith.index_cast %3 : i32 to index
    %c0 = arith.constant 0 : index
    %5 = vector.load %arg1[%4, %c0] : memref<808x128xf32, #tpu.memory_space<vmem>>, vector<128x128xf32>
    %6 = arith.truncf %5 : vector<128x128xf32> to vector<128x128xbf16>
    %c0_0 = arith.constant 0 : index
    %c0_1 = arith.constant 0 : index
    %c0_2 = arith.constant 0 : index
    %7 = vector.load %arg2[%c0_0, %c0_1, %c0_2] : memref<9x128x128xbf16, #tpu.memory_space<vmem>>, vector<1x128x128xbf16>
    %8 = vector.shape_cast %7 : vector<1x128x128xbf16> to vector<128x128xbf16>
    %cst_3 = arith.constant dense<0.000000e+00> : vector<128x128xf32>
    %9 = tpu.matmul %6, %8, %cst_3 {dimension_numbers = #tpu.dot_dimension_numbers<[1], [0], [0], [1], [0, 0, 1, 1], [], []>} : vector<128x128xbf16>, vector<128x128xbf16>, vector<128x128xf32> -> vector<128x128xf32>
    %10 = arith.addf %2, %9 : vector<128x128xf32>
    %c1_i32 = arith.constant 1 : i32
    %11 = arith.addi %1, %c1_i32 : i32
    %12 = arith.index_cast %11 : i32 to index
    %c0_4 = arith.constant 0 : index
    %13 = vector.load %arg1[%12, %c0_4] : memref<808x128xf32, #tpu.memory_space<vmem>>, vector<128x128xf32>
    %14 = arith.truncf %13 : vector<128x128xf32> to vector<128x128xbf16>
    %c1 = arith.constant 1 : index
    %c0_5 = arith.constant 0 : index
    %c0_6 = arith.constant 0 : index
    %15 = vector.load %arg2[%c1, %c0_5, %c0_6] : memref<9x128x128xbf16, #tpu.memory_space<vmem>>, vector<1x128x128xbf16>
    %16 = vector.shape_cast %15 : vector<1x128x128xbf16> to vector<128x128xbf16>
    %cst_7 = arith.constant dense<0.000000e+00> : vector<128x128xf32>
    %17 = tpu.matmul %14, %16, %cst_7 {dimension_numbers = #tpu.dot_dimension_numbers<[1], [0], [0], [1], [0, 0, 1, 1], [], []>} : vector<128x128xbf16>, vector<128x128xbf16>, vector<128x128xf32> -> vector<128x128xf32>
    %18 = arith.addf %10, %17 : vector<128x128xf32>
    %c2_i32 = arith.constant 2 : i32
    %19 = arith.addi %1, %c2_i32 : i32
    %20 = arith.index_cast %19 : i32 to index
    %c0_8 = arith.constant 0 : index
    %21 = vector.load %arg1[%20, %c0_8] : memref<808x128xf32, #tpu.memory_space<vmem>>, vector<128x128xf32>
    %22 = arith.truncf %21 : vector<128x128xf32> to vector<128x128xbf16>
    %c2 = arith.constant 2 : index
    %c0_9 = arith.constant 0 : index
    %c0_10 = arith.constant 0 : index
    %23 = vector.load %arg2[%c2, %c0_9, %c0_10] : memref<9x128x128xbf16, #tpu.memory_space<vmem>>, vector<1x128x128xbf16>
    %24 = vector.shape_cast %23 : vector<1x128x128xbf16> to vector<128x128xbf16>
    %cst_11 = arith.constant dense<0.000000e+00> : vector<128x128xf32>
    %25 = tpu.matmul %22, %24, %cst_11 {dimension_numbers = #tpu.dot_dimension_numbers<[1], [0], [0], [1], [0, 0, 1, 1], [], []>} : vector<128x128xbf16>, vector<128x128xbf16>, vector<128x128xf32> -> vector<128x128xf32>
    %26 = arith.addf %18, %25 : vector<128x128xf32>
    %c18_i32 = arith.constant 18 : i32
    %27 = arith.addi %1, %c18_i32 : i32
    %28 = arith.index_cast %27 : i32 to index
    %c0_12 = arith.constant 0 : index
    %29 = vector.load %arg1[%28, %c0_12] : memref<808x128xf32, #tpu.memory_space<vmem>>, vector<128x128xf32>
    %30 = arith.truncf %29 : vector<128x128xf32> to vector<128x128xbf16>
    %c3 = arith.constant 3 : index
    %c0_13 = arith.constant 0 : index
    %c0_14 = arith.constant 0 : index
    %31 = vector.load %arg2[%c3, %c0_13, %c0_14] : memref<9x128x128xbf16, #tpu.memory_space<vmem>>, vector<1x128x128xbf16>
    %32 = vector.shape_cast %31 : vector<1x128x128xbf16> to vector<128x128xbf16>
    %cst_15 = arith.constant dense<0.000000e+00> : vector<128x128xf32>
    %33 = tpu.matmul %30, %32, %cst_15 {dimension_numbers = #tpu.dot_dimension_numbers<[1], [0], [0], [1], [0, 0, 1, 1], [], []>} : vector<128x128xbf16>, vector<128x128xbf16>, vector<128x128xf32> -> vector<128x128xf32>
    %34 = arith.addf %26, %33 : vector<128x128xf32>
    %c19_i32 = arith.constant 19 : i32
    %35 = arith.addi %1, %c19_i32 : i32
    %36 = arith.index_cast %35 : i32 to index
    %c0_16 = arith.constant 0 : index
    %37 = vector.load %arg1[%36, %c0_16] : memref<808x128xf32, #tpu.memory_space<vmem>>, vector<128x128xf32>
    %38 = arith.truncf %37 : vector<128x128xf32> to vector<128x128xbf16>
    %c4 = arith.constant 4 : index
    %c0_17 = arith.constant 0 : index
    %c0_18 = arith.constant 0 : index
    %39 = vector.load %arg2[%c4, %c0_17, %c0_18] : memref<9x128x128xbf16, #tpu.memory_space<vmem>>, vector<1x128x128xbf16>
    %40 = vector.shape_cast %39 : vector<1x128x128xbf16> to vector<128x128xbf16>
    %cst_19 = arith.constant dense<0.000000e+00> : vector<128x128xf32>
    %41 = tpu.matmul %38, %40, %cst_19 {dimension_numbers = #tpu.dot_dimension_numbers<[1], [0], [0], [1], [0, 0, 1, 1], [], []>} : vector<128x128xbf16>, vector<128x128xbf16>, vector<128x128xf32> -> vector<128x128xf32>
    %42 = arith.addf %34, %41 : vector<128x128xf32>
    %c20_i32 = arith.constant 20 : i32
    %43 = arith.addi %1, %c20_i32 : i32
    %44 = arith.index_cast %43 : i32 to index
    %c0_20 = arith.constant 0 : index
    %45 = vector.load %arg1[%44, %c0_20] : memref<808x128xf32, #tpu.memory_space<vmem>>, vector<128x128xf32>
    %46 = arith.truncf %45 : vector<128x128xf32> to vector<128x128xbf16>
    %c5 = arith.constant 5 : index
    %c0_21 = arith.constant 0 : index
    %c0_22 = arith.constant 0 : index
    %47 = vector.load %arg2[%c5, %c0_21, %c0_22] : memref<9x128x128xbf16, #tpu.memory_space<vmem>>, vector<1x128x128xbf16>
    %48 = vector.shape_cast %47 : vector<1x128x128xbf16> to vector<128x128xbf16>
    %cst_23 = arith.constant dense<0.000000e+00> : vector<128x128xf32>
    %49 = tpu.matmul %46, %48, %cst_23 {dimension_numbers = #tpu.dot_dimension_numbers<[1], [0], [0], [1], [0, 0, 1, 1], [], []>} : vector<128x128xbf16>, vector<128x128xbf16>, vector<128x128xf32> -> vector<128x128xf32>
    %50 = arith.addf %42, %49 : vector<128x128xf32>
    %c36_i32 = arith.constant 36 : i32
    %51 = arith.addi %1, %c36_i32 : i32
    %52 = arith.index_cast %51 : i32 to index
    %c0_24 = arith.constant 0 : index
    %53 = vector.load %arg1[%52, %c0_24] : memref<808x128xf32, #tpu.memory_space<vmem>>, vector<128x128xf32>
    %54 = arith.truncf %53 : vector<128x128xf32> to vector<128x128xbf16>
    %c6 = arith.constant 6 : index
    %c0_25 = arith.constant 0 : index
    %c0_26 = arith.constant 0 : index
    %55 = vector.load %arg2[%c6, %c0_25, %c0_26] : memref<9x128x128xbf16, #tpu.memory_space<vmem>>, vector<1x128x128xbf16>
    %56 = vector.shape_cast %55 : vector<1x128x128xbf16> to vector<128x128xbf16>
    %cst_27 = arith.constant dense<0.000000e+00> : vector<128x128xf32>
    %57 = tpu.matmul %54, %56, %cst_27 {dimension_numbers = #tpu.dot_dimension_numbers<[1], [0], [0], [1], [0, 0, 1, 1], [], []>} : vector<128x128xbf16>, vector<128x128xbf16>, vector<128x128xf32> -> vector<128x128xf32>
    %58 = arith.addf %50, %57 : vector<128x128xf32>
    %c37_i32 = arith.constant 37 : i32
    %59 = arith.addi %1, %c37_i32 : i32
    %60 = arith.index_cast %59 : i32 to index
    %c0_28 = arith.constant 0 : index
    %61 = vector.load %arg1[%60, %c0_28] : memref<808x128xf32, #tpu.memory_space<vmem>>, vector<128x128xf32>
    %62 = arith.truncf %61 : vector<128x128xf32> to vector<128x128xbf16>
    %c7 = arith.constant 7 : index
    %c0_29 = arith.constant 0 : index
    %c0_30 = arith.constant 0 : index
    %63 = vector.load %arg2[%c7, %c0_29, %c0_30] : memref<9x128x128xbf16, #tpu.memory_space<vmem>>, vector<1x128x128xbf16>
    %64 = vector.shape_cast %63 : vector<1x128x128xbf16> to vector<128x128xbf16>
    %cst_31 = arith.constant dense<0.000000e+00> : vector<128x128xf32>
    %65 = tpu.matmul %62, %64, %cst_31 {dimension_numbers = #tpu.dot_dimension_numbers<[1], [0], [0], [1], [0, 0, 1, 1], [], []>} : vector<128x128xbf16>, vector<128x128xbf16>, vector<128x128xf32> -> vector<128x128xf32>
    %66 = arith.addf %58, %65 : vector<128x128xf32>
    %c38_i32 = arith.constant 38 : i32
    %67 = arith.addi %1, %c38_i32 : i32
    %68 = arith.index_cast %67 : i32 to index
    %c0_32 = arith.constant 0 : index
    %69 = vector.load %arg1[%68, %c0_32] : memref<808x128xf32, #tpu.memory_space<vmem>>, vector<128x128xf32>
    %70 = arith.truncf %69 : vector<128x128xf32> to vector<128x128xbf16>
    %c8 = arith.constant 8 : index
    %c0_33 = arith.constant 0 : index
    %c0_34 = arith.constant 0 : index
    %71 = vector.load %arg2[%c8, %c0_33, %c0_34] : memref<9x128x128xbf16, #tpu.memory_space<vmem>>, vector<1x128x128xbf16>
    %72 = vector.shape_cast %71 : vector<1x128x128xbf16> to vector<128x128xbf16>
    %cst_35 = arith.constant dense<0.000000e+00> : vector<128x128xf32>
    %73 = tpu.matmul %70, %72, %cst_35 {dimension_numbers = #tpu.dot_dimension_numbers<[1], [0], [0], [1], [0, 0, 1, 1], [], []>} : vector<128x128xbf16>, vector<128x128xbf16>, vector<128x128xf32> -> vector<128x128xf32>
    %74 = arith.addf %66, %73 : vector<128x128xf32>
    %c0_36 = arith.constant 0 : index
    %c0_37 = arith.constant 0 : index
    %75 = vector.load %arg3[%c0_36, %c0_37] : memref<1x128xf32, #tpu.memory_space<vmem>>, vector<1x128xf32>
    %76 = vector.broadcast %75 : vector<1x128xf32> to vector<128x128xf32>
    %77 = arith.addf %74, %76 : vector<128x128xf32>
    %cst_38 = arith.constant 0.000000e+00 : f32
    %78 = vector.broadcast %cst_38 : f32 to vector<128x128xf32>
    %79 = arith.maximumf %77, %78 : vector<128x128xf32>
    %c0_39 = arith.constant 0 : index
    %c0_40 = arith.constant 0 : index
    %80 = vector.load %arg4[%c0_39, %c0_40] : memref<128x128xf32, #tpu.memory_space<vmem>>, vector<128x128xf32>
    tpu.vector_store %arg4[%c0_39, %c0_40], %79 {strides = array<i32>} : memref<128x128xf32, #tpu.memory_space<vmem>>, vector<128x128xf32>,
    return
  }
  func.func @transform_0(%arg0: i32) -> (i32, i32) {
    %c0_i32 = arith.constant 0 : i32
    %c0_i32_0 = arith.constant 0 : i32
    %c0_i32_1 = arith.constant 0 : i32
    return %c0_i32, %c0_i32_0 : i32, i32
  }
  func.func @transform_1(%arg0: i32) -> (i32, i32, i32) {
    %c0_i32 = arith.constant 0 : i32
    %c0_i32_0 = arith.constant 0 : i32
    %c0_i32_1 = arith.constant 0 : i32
    %c0_i32_2 = arith.constant 0 : i32
    return %c0_i32, %c0_i32_0, %c0_i32_1 : i32, i32, i32
  }
  func.func @transform_2(%arg0: i32) -> (i32, i32) {
    %c0_i32 = arith.constant 0 : i32
    %c0_i32_0 = arith.constant 0 : i32
    %c0_i32_1 = arith.constant 0 : i32
    return %c0_i32, %c0_i32_0 : i32, i32
  }
  func.func @transform_3(%arg0: i32) -> (i32, i32) {
    %c0_i32 = arith.constant 0 : i32
    %c0_i32_0 = arith.constant 0 : i32
    return %arg0, %c0_i32 : i32, i32
  }
}

</mosaic_0001>

<bundles_post_ra>
// kernel: tpu_custom_call.1
= control target key start
LH: loop header
LB: loop body
LE: loop exit
PB: predicated region body
PF: predicated region fallthrough
CT: control target
= control target key end

     0   :  { %8 = vsyncpa [#allocation3], 0  ;;  %s2838_s0 = inlined_call_operand.hbm [shape: f32[808,128], index: 0, kind: input, shape index: {}]   ;;  %s2839_s1 = inlined_call_operand.hbm [shape: bf16[9,128,128], index: 1, kind: input, shape index: {}]   ;;  %s2840_s2 = inlined_call_operand.vmem [shape: f32[1,128], index: 2, kind: input, shape index: {}]   ;;  %s2841_s3 = inlined_call_operand.hbm [shape: f32[768,128], index: 3, kind: output, shape index: {}]  }
   0x1   :  { %9 = vsyncpa [#allocation6], 0 }
   0x2   :  { %10 = vsyncpa [#allocation4], 0 }
   0x3   :  { %12 = vsyncpa [#allocation4 + $0x1], 0  ;;  %s2483_s12 = smov 0   ;;  %s2485_s13 = smov 0  }
   0x4   :  { %s2487_s14 = smov 0   ;;  %s2489_s15 = smov 0  }
   0x5 LB: > { %s2504_s16 = sadd.s32 4294967295, %s2453_s15   ;;  %s1721_s17 = sadd.s32 4294967294, %s2453_s15   ;;  %s2453_s15 = sphi %s2489_s15, %s2848_s15   ;;  %s2449_s14 = sphi %s2487_s14, %s2847_s14   ;;  %s2445_s13 = sphi %s2485_s13, %s2846_s13   ;;  %s2441_s12 = sphi %s2483_s12, %s2845_s12  }
   0x6   : > { %s2508_s18 = sadd.s32 1, %s2453_s15   ;;  %s88_s19 = sadd.s32 1, %s2449_s14 }
   0x7   : > { %s85_s20 = ssub.s32 %s2453_s15, %s2508_s18  ;;  %p98_p0 = scmp.ne.s32.totalorder %s2449_s14, %s2445_s13 }
   0x8   : > { %p86_p1 = scmp.eq.s32.totalorder %s85_s20, 0  ;;  %p99_p2 = scmp.eq.s32.totalorder %s2504_s16, 5 }
   0x9   : > { %p104_p3 = scmp.ne.s32.totalorder %s2445_s13, %s2441_s12  ;;  %p105_p4 = scmp.eq.s32.totalorder %s1721_s17, 5 }
   0xa   : > { %s2519_s21 = scalar_select %p86_p1, %s2449_s14, %s88_s19  }
   0xb   : > { %p2521_p5 = por %p99_p2, %p98_p0  ;;  %p2525_p6 = por %p105_p4, %p104_p3 }
   0xc   : > { %p1722_p7 = scmp.ge.s32.totalorder %s2453_s15, 1  ;;  %p112_p8 = scmp.lt.s32.totalorder %s2453_s15, 7 }
   0xd   : > { %p2277_p9 = scmp.eq.s32.totalorder %s2504_s16, 0  ;;  %s123_s27 = sshll.u32 %s2838_s0, 4  ;;  %s124_s27 = int_to_ptr.hbm [resolvable:$true] %s123_s27 }
   0xe   : > { %p2532_p10 = pnand %p1722_p7, %p112_p8  ;;  %s2455_s28 = smov [#allocation2]  }
   0xf   : > { %s125_s29 = sshll.u32 %s2455_s28, 4  ;;  %s137_s5 = sshll.u32 %s2839_s1, 4  ;;  %s126_s29 = int_to_ptr.vmem [resolvable:$true] %s125_s29  ;;  %s138_s5 = int_to_ptr.hbm [resolvable:$true] %s137_s5 }
  0x10   : > { %p2266_p11 = pneg %p2532_p10  ;;  %s2456_s6 = smov 128  }
  0x11   : > { %s2457_s7 = smov 8   ;;  %s2458_s8 = smov [#allocation5]  }
  0x12   : > { %p2267_p12 = pnand %p2277_p9, %p2266_p11  ;;  %s139_s9 = sshll.u32 %s2458_s8, 4  ;;  %s140_s9 = int_to_ptr.vmem [resolvable:$true] %s139_s9 }
  0x13   : > { %s2459_s10 = smov 64   ;;  %s2460_s11 = smov 4  }
  0x14   : > { %2269 = dma.hbm_to_vmem [thread:$0]  (!%p2267_p12), %s124_s27, 12928, %s126_s29, [#allocation3], %s2456_s6, %s2456_s6, %s2457_s7  }
  0x15   : > { %2272 = dma.hbm_to_vmem [thread:$0]  (!%p2267_p12), %s138_s5, 9216, %s140_s9, [#allocation6], %s2459_s10, %s2459_s10, %s2460_s11  }
  0x16   : > { %158 = sbr.rel (%p2532_p10) target bundleno = 488 (0x1e8), region = 32 }
  0x1b   : > { %2428 = dma.done.wait (%p2277_p9), [#allocation3], 12928  }
  0x1c   : > { %2430 = vsyncadd (%p2277_p9), [#allocation3], 4294954368 }
  0x1d   : > { %2432 = dma.done.wait (%p2277_p9), [#allocation6], 9216  }
  0x1e   : > { %2434 = vsyncadd (%p2277_p9), [#allocation6], 4294958080  ;;  %v2174_v0 = vld [vmem:[#allocation5 + $0x78] sm:$0xff]  ;;  %v2173_v1 = vld [vmem:[#allocation5 + $0x70] sm:$0xff]  ;;  %s1729_s17 = sshll.u32 %s2504_s16, 7  ;;  %s180_s20 = sand.u32 1, %s2445_s13  }
  0x1f   : > { %2232 = vmatpush.bf16.msra.mxu1 %v2174_v0  ;;  %2233 = vmatpush.bf16.msra.mxu2 %v2174_v0  ;;  %v2172_v2 = vld [vmem:[#allocation5 + $0x68] sm:$0xff]  ;;  %v2171_v3 = vld [vmem:[#allocation5 + $0x60] sm:$0xff]  ;;  %v2170_v4 = vld [vmem:[#allocation5 + $0x58] sm:$0xff]  ;;  %s2559_s19 = scalar_lea.vmem [#allocation2], %s1729_s17  ;;  %s1728_s26 = sshll.u32 %s180_s20, 7 }
  0x20   : > { %2234 = vmatpush.bf16.msra.mxu3 %v2174_v0  ;;  %317 = vmatpush.bf16.msra.mxu0 %v2174_v0  ;;  %v2169_v5 = vld [vmem:[#allocation5 + $0x50] sm:$0xff]  ;;  %v2168_v6 = vld [vmem:[#allocation5 + $0x48] sm:$0xff]  ;;  %v2167_v7 = vld [vmem:[#allocation5 + $0x40] sm:$0xff]  ;;  %s2756_s27 = scalar_lea.vmem [#allocation7], %s1728_s26  ;;  %s1619_s30 = scalar_lea.hbm %s2841_s3, %s1729_s17 }
  0x21   : > { %v1735_v8 = vld [vmem:[%s2559_s19 + $0x21] sm:$0xff]  ;;  %v1736_v9 = vld [vmem:[%s2559_s19 + $0x29] sm:$0xff]  ;;  %v2181_v24 = vld [vmem:[#allocation5 + $0xb0] sm:$0xff]  ;;  %s1620_s4 = sshll.u32 %s2756_s27, 4  ;;  %s1622_s5 = sshll.u32 %s1619_s30, 4  ;;  %s1621_s4 = int_to_ptr.vmem [resolvable:$true] %s1620_s4  ;;  %s1623_s5 = int_to_ptr.hbm [resolvable:$true] %s1622_s5 }
  0x22   : > { %v1739_v10 = vld [vmem:[%s2559_s19 + $0x41] sm:$0xff]  ;;  %v1740_v11 = vld [vmem:[%s2559_s19 + $0x49] sm:$0xff]  ;;  %v246_v18 = vpack.c.bf16 %v1736_v9, %v1735_v8  ;;  %v2165_v25 = vld [vmem:[#allocation5 + $0x30] sm:$0xff]  ;;  %s1608_s6 = scalar_lea.sflag [#allocation4], %s180_s20  ;;  %s2397_s16 = sshra.s32 %s1623_s5, 4  ;;  %s2398_s16 = int_to_ptr.hbm [resolvable:$true] %s2397_s16 }
  0x23   : > { %2235 = vmatpush.bf16.msra.mxu1 %v2173_v1  ;;  %2236 = vmatpush.bf16.msra.mxu2 %v2173_v1  ;;  %v1743_v12 = vld [vmem:[%s2559_s19 + $0x61] sm:$0xff]  ;;  %v1744_v13 = vld [vmem:[%s2559_s19 + $0x69] sm:$0xff]  ;;  %v248_v19 = vpack.c.bf16 %v1740_v11, %v1739_v10  ;;  %v2189_v26 = vld [vmem:[#allocation5 + $0xf0] sm:$0xff]  ;;  %s2399_s7 = scalar_lea.hbm %s2398_s16, 128  ;;  %s2403_s10 = scalar_lea.hbm %s2841_s3, 768 }
  0x24   : > { %2237 = vmatpush.bf16.msra.mxu3 %v2173_v1  ;;  %318 = vmatpush.bf16.msra.mxu0 %v2173_v1  ;;  %v1731_v14 = vld [vmem:[%s2559_s19 + $0x1] sm:$0xff]  ;;  %v1732_v15 = vld [vmem:[%s2559_s19 + $0x9] sm:$0xff]  ;;  %v250_v20 = vpack.c.bf16 %v1744_v13, %v1743_v12  ;;  %v2197_v27 = vld [vmem:[#allocation5 + $0x130] sm:$0xff]  ;;  %p2400_p13 = scmp.ne.s32.totalorder %s2398_s16, %s2399_s7  ;;  %p2404_p2 = scmp.lt.s32.totalorder %s2398_s16, %s2841_s3 }
  0x25   : > { %v2182_v16 = vld [vmem:[#allocation5 + $0xb8] sm:$0xff]  ;;  %v244_v21 = vpack.c.bf16 %v1732_v15, %v1731_v14  ;;  %v2180_v28 = vld [vmem:[#allocation5 + $0xa8] sm:$0xff]  ;;  %v2179_v32 = vld [vmem:[#allocation5 + $0xa0] sm:$0xff]  ;;  %p2405_p3 = scmp.lt.s32.totalorder %s2403_s10, %s2399_s7 }
  0x26   : > { %v2166_v17 = vld [vmem:[#allocation5 + $0x38] sm:$0xff]  ;;  %v2164_v29 = vld [vmem:[#allocation5 + $0x28] sm:$0xff]  ;;  %v2163_v33 = vld [vmem:[#allocation5 + $0x20] sm:$0xff]  ;;  %p2401_p0 = pnand %p2400_p13, %p2521_p5 }
  0x27   : > { %2238 = vmatpush.bf16.msra.mxu1 %v2172_v2  ;;  %2239 = vmatpush.bf16.msra.mxu2 %v2172_v2  ;;  %v2190_v22 = vld [vmem:[#allocation5 + $0xf8] sm:$0xff]  ;;  %v2188_v30 = vld [vmem:[#allocation5 + $0xe8] sm:$0xff]  ;;  %v2187_v34 = vld [vmem:[#allocation5 + $0xe0] sm:$0xff]  ;;  %p2406_p4 = por %p2405_p3, %p2404_p2 }
  0x28   : > { %2240 = vmatpush.bf16.msra.mxu3 %v2172_v2  ;;  %319 = vmatpush.bf16.msra.mxu0 %v2172_v2  ;;  %v2198_v23 = vld [vmem:[#allocation5 + $0x138] sm:$0xff]  ;;  %v2196_v31 = vld [vmem:[#allocation5 + $0x128] sm:$0xff]  ;;  %v2195_v35 = vld [vmem:[#allocation5 + $0x120] sm:$0xff]  ;;  %p2402_p1 = pneg %p2401_p0 }
  0x29   : > { %v1737_v36 = vld [vmem:[%s2559_s19 + $0x31] sm:$0xff]  ;;  %v1738_v37 = vld [vmem:[%s2559_s19 + $0x39] sm:$0xff]  ;;  %v2175_v60 = vld [vmem:[#allocation5 + $0x80] sm:$0xff] }
  0x2a   : > { %v1741_v38 = vld [vmem:[%s2559_s19 + $0x51] sm:$0xff]  ;;  %v1742_v39 = vld [vmem:[%s2559_s19 + $0x59] sm:$0xff]  ;;  %v247_v46 = vpack.c.bf16 %v1738_v37, %v1737_v36  ;;  %v2159_v61 = vld [vmem:[#allocation5] sm:$0xff]  ;;  %p2407_p7 = pnand %p2406_p4, %p2402_p1 }
  0x2b   : > { %2241 = vmatpush.bf16.msra.mxu1 %v2171_v3  ;;  %2242 = vmatpush.bf16.msra.mxu2 %v2171_v3  ;;  %v1745_v40 = vld [vmem:[%s2559_s19 + $0x71] sm:$0xff]  ;;  %v1746_v41 = vld [vmem:[%s2559_s19 + $0x79] sm:$0xff]  ;;  %v249_v47 = vpack.c.bf16 %v1742_v39, %v1741_v38  ;;  %v2183_v63 = vld [vmem:[#allocation5 + $0xc0] sm:$0xff] }
  0x2c   : > { %2243 = vmatpush.bf16.msra.mxu3 %v2171_v3  ;;  %320 = vmatpush.bf16.msra.mxu0 %v2171_v3  ;;  %v1733_v42 = vld [vmem:[%s2559_s19 + $0x11] sm:$0xff]  ;;  %v1734_v43 = vld [vmem:[%s2559_s19 + $0x19] sm:$0xff]  ;;  %v251_v48 = vpack.c.bf16 %v1746_v41, %v1745_v40  ;;  %v2191_v0 = vld [vmem:[#allocation5 + $0x100] sm:$0xff] }
  0x2d   : > { %v2178_v44 = vld [vmem:[#allocation5 + $0x98] sm:$0xff]  ;;  %v245_v49 = vpack.c.bf16 %v1734_v43, %v1733_v42  ;;  %v2177_v52 = vld [vmem:[#allocation5 + $0x90] sm:$0xff]  ;;  %v2176_v56 = vld [vmem:[#allocation5 + $0x88] sm:$0xff] }
  0x2e   : > { %v2162_v45 = vld [vmem:[#allocation5 + $0x18] sm:$0xff]  ;;  %v2161_v53 = vld [vmem:[#allocation5 + $0x10] sm:$0xff]  ;;  %v2160_v57 = vld [vmem:[#allocation5 + $0x8] sm:$0xff] }
  0x2f   : > { %2244 = vmatpush.bf16.msra.mxu1 %v2170_v4  ;;  %2245 = vmatpush.bf16.msra.mxu2 %v2170_v4  ;;  %v2186_v50 = vld [vmem:[#allocation5 + $0xd8] sm:$0xff]  ;;  %v2185_v54 = vld [vmem:[#allocation5 + $0xd0] sm:$0xff]  ;;  %v2184_v58 = vld [vmem:[#allocation5 + $0xc8] sm:$0xff] }
  0x30   : > { %2246 = vmatpush.bf16.msra.mxu3 %v2170_v4  ;;  %321 = vmatpush.bf16.msra.mxu0 %v2170_v4  ;;  %v2194_v51 = vld [vmem:[#allocation5 + $0x118] sm:$0xff]  ;;  %v2193_v55 = vld [vmem:[#allocation5 + $0x110] sm:$0xff]  ;;  %v2192_v59 = vld [vmem:[#allocation5 + $0x108] sm:$0xff] }
  0x31   : > { %v186_v62 = vld [vmem:[%s2559_s19] sm:$0xff]  ;;  %v187_v1 = vld [vmem:[%s2559_s19 + $0x8] sm:$0xff]  ;;  %v1910_v8 = vld [vmem:[%s2559_s19 + $0x13] sm:$0xff] }
  0x32   : > { %v2214_v2 = vld [vmem:[#allocation5 + $0x1b8] sm:$0xff]  ;;  %v202_v12 = vpack.c.bf16 %v187_v1, %v186_v62  ;;  %v2227_v36 = vld [vmem:[#allocation5 + $0x220] sm:$0xff]  ;;  %v1865_v39 = vld [vmem:[%s2559_s19 + $0x32] sm:$0xff] }
  0x33   : > { %2247 = vmatpush.bf16.msra.mxu1 %v2169_v5  ;;  %2248 = vmatpush.bf16.msra.mxu2 %v2169_v5  ;;  %v2206_v3 = vld [vmem:[#allocation5 + $0x178] sm:$0xff]  ;;  %v191_v38 = vld [vmem:[%s2559_s19 + $0x28] sm:$0xff]  ;;  %v1914_v41 = vld [vmem:[%s2559_s19 + $0x33] sm:$0xff] }
  0x34   : > { %2249 = vmatpush.bf16.msra.mxu3 %v2169_v5  ;;  %322 = vmatpush.bf16.msra.mxu0 %v2169_v5  ;;  %v1812_v4 = vld [vmem:[%s2559_s19 + $0x2] sm:$0xff]  ;;  %v1813_v5 = vld [vmem:[%s2559_s19 + $0xa] sm:$0xff]  ;;  %v1866_v40 = vld [vmem:[%s2559_s19 + $0x3a] sm:$0xff] }
  0x35   : > { %v1911_v9 = vld [vmem:[%s2559_s19 + $0x1b] sm:$0xff]  ;;  %v481_v13 = vpack.c.bf16 %v1813_v5, %v1812_v4  ;;  %v1869_v1 = vld [vmem:[%s2559_s19 + $0x52] sm:$0xff] }
  0x36   : > { %v2222_v10 = vld [vmem:[#allocation5 + $0x1f8] sm:$0xff]  ;;  %v793_v15 = vpack.c.bf16 %v1911_v9, %v1910_v8  ;;  %v2225_v62 = vld [vmem:[#allocation5 + $0x210] sm:$0xff]  ;;  %v2208_v8 = vld [vmem:[#allocation5 + $0x188] sm:$0xff] }
  0x37   : > { %2250 = vmatpush.bf16.msra.mxu1 %v2168_v6  ;;  %2251 = vmatpush.bf16.msra.mxu2 %v2168_v6  ;;  %v2230_v11 = vld [vmem:[#allocation5 + $0x238] sm:$0xff]  ;;  %v2216_v9 = vld [vmem:[#allocation5 + $0x1c8] sm:$0xff] }
  0x38   : > { %2252 = vmatpush.bf16.msra.mxu3 %v2168_v6  ;;  %323 = vmatpush.bf16.msra.mxu0 %v2168_v6  ;;  %v1861_v6 = vld [vmem:[%s2559_s19 + $0x12] sm:$0xff]  ;;  %v190_v37 = vld [vmem:[%s2559_s19 + $0x20] sm:$0xff] }
  0x39   : > { %v1915_v42 = vld [vmem:[%s2559_s19 + $0x3b] sm:$0xff]  ;;  %v204_v43 = vpack.c.bf16 %v191_v38, %v190_v37 }
  0x3a   : > { %v1919_v4 = vld [vmem:[%s2559_s19 + $0x5b] sm:$0xff] }
  0x3b   : > { %2253 = vmatpush.bf16.msra.mxu1 %v2167_v7  ;;  %2254 = vmatpush.bf16.msra.mxu2 %v2167_v7 }
  0x3c   : > { %2255 = vmatpush.bf16.msra.mxu3 %v2167_v7  ;;  %324 = vmatpush.bf16.msra.mxu0 %v2167_v7  ;;  %v1862_v7 = vld [vmem:[%s2559_s19 + $0x1a] sm:$0xff] }
  0x3d   : > { %v637_v14 = vpack.c.bf16 %v1862_v7, %v1861_v6 }
  0x3e   : > { %335 = vmatmul.bf16.vlgmr.msra.gmra.mxu1 %v246_v18  ;;  %345 = vmatmul.bf16.vlgmr.msra.gmra.mxu2 %v248_v19  ;;  %v2221_v18 = vld [vmem:[#allocation5 + $0x1f0] sm:$0xff] }
  0x3f   : > { %554 = vmatpush.bf16.msrb.mxu2 %v2182_v16  ;;  %414 = vmatpush.bf16.msrb.mxu1 %v2166_v17  ;;  %v2213_v16 = vld [vmem:[#allocation5 + $0x1b0] sm:$0xff] }
  0x40   : > { %355 = vmatmul.bf16.vlgmr.msra.gmra.mxu3 %v250_v20  ;;  %325 = vmatmul.bf16.vlgmr.msra.gmra.mxu0 %v244_v21  ;;  %v2205_v17 = vld [vmem:[#allocation5 + $0x170] sm:$0xff]  ;;  %v2212_v20 = vld [vmem:[#allocation5 + $0x1a8] sm:$0xff] }
  0x41   : > { %710 = vmatpush.bf16.msrb.mxu3 %v2190_v22  ;;  %866 = vmatpush.bf16.msrb.mxu0 %v2198_v23  ;;  %v2229_v19 = vld [vmem:[#allocation5 + $0x230] sm:$0xff]  ;;  %v2204_v21 = vld [vmem:[#allocation5 + $0x168] sm:$0xff] }
  0x42   : > { %v2220_v22 = vld [vmem:[#allocation5 + $0x1e8] sm:$0xff] }
  0x43   : > { %555 = vmatpush.bf16.msrb.mxu2 %v2181_v24  ;;  %415 = vmatpush.bf16.msrb.mxu1 %v2165_v25  ;;  %v2228_v23 = vld [vmem:[#allocation5 + $0x228] sm:$0xff]  ;;  %v189_v25 = vld [vmem:[%s2559_s19 + $0x18] sm:$0xff] }
  0x44   : > { %v188_v24 = vld [vmem:[%s2559_s19 + $0x10] sm:$0xff] }
  0x45   : > { %711 = vmatpush.bf16.msrb.mxu3 %v2189_v26  ;;  %867 = vmatpush.bf16.msrb.mxu0 %v2197_v27  ;;  %v1863_v26 = vld [vmem:[%s2559_s19 + $0x22] sm:$0xff]  ;;  %v1864_v27 = vld [vmem:[%s2559_s19 + $0x2a] sm:$0xff] }
  0x47   : > { %556 = vmatpush.bf16.msrb.mxu2 %v2180_v28  ;;  %416 = vmatpush.bf16.msrb.mxu1 %v2164_v29  ;;  %v1912_v28 = vld [vmem:[%s2559_s19 + $0x23] sm:$0xff]  ;;  %v1913_v29 = vld [vmem:[%s2559_s19 + $0x2b] sm:$0xff] }
  0x49   : > { %712 = vmatpush.bf16.msrb.mxu3 %v2188_v30  ;;  %868 = vmatpush.bf16.msrb.mxu0 %v2196_v31  ;;  %v203_v30 = vpack.c.bf16 %v189_v25, %v188_v24  ;;  %v638_v31 = vpack.c.bf16 %v1864_v27, %v1863_v26  ;;  %v2223_v24 = vld [vmem:[#allocation5 + $0x200] sm:$0xff]  ;;  %v198_v25 = vld [vmem:[%s2559_s19 + $0x60] sm:$0xff]  ;;  %v1873_v27 = vld [vmem:[%s2559_s19 + $0x72] sm:$0xff] }
  0x4a   : > { %v199_v26 = vld [vmem:[%s2559_s19 + $0x68] sm:$0xff] }
  0x4b   : > { %557 = vmatpush.bf16.msrb.mxu2 %v2179_v32  ;;  %417 = vmatpush.bf16.msrb.mxu1 %v2163_v33  ;;  %v794_v32 = vpack.c.bf16 %v1913_v29, %v1912_v28  ;;  %v2211_v33 = vld [vmem:[#allocation5 + $0x1a0] sm:$0xff]  ;;  %v1874_v28 = vld [vmem:[%s2559_s19 + $0x7a] sm:$0xff] }
  0x4c   : > { %v1922_v29 = vld [vmem:[%s2559_s19 + $0x73] sm:$0xff] }
  0x4d   : > { %713 = vmatpush.bf16.msrb.mxu3 %v2187_v34  ;;  %869 = vmatpush.bf16.msrb.mxu0 %v2195_v35  ;;  %v2219_v34 = vld [vmem:[#allocation5 + $0x1e0] sm:$0xff] }
  0x4e   : > { %340 = vmatmul.bf16.gmra.mxu1 %v247_v46  ;;  %350 = vmatmul.bf16.gmra.mxu2 %v249_v47  ;;  %v2203_v35 = vld [vmem:[#allocation5 + $0x160] sm:$0xff]  ;;  %v2210_v46 = vld [vmem:[#allocation5 + $0x198] sm:$0xff] }
  0x4f   : > { %558 = vmatpush.bf16.msrb.mxu2 %v2178_v44  ;;  %418 = vmatpush.bf16.msrb.mxu1 %v2162_v45  ;;  %v639_v44 = vpack.c.bf16 %v1866_v40, %v1865_v39  ;;  %v795_v45 = vpack.c.bf16 %v1915_v42, %v1914_v41  ;;  %v2218_v47 = vld [vmem:[#allocation5 + $0x1d8] sm:$0xff]  ;;  %v200_v40 = vld [vmem:[%s2559_s19 + $0x70] sm:$0xff]  ;;  %v201_v41 = vld [vmem:[%s2559_s19 + $0x78] sm:$0xff] }
  0x50   : > { %360 = vmatmul.bf16.gmra.mxu3 %v251_v48  ;;  %330 = vmatmul.bf16.gmra.mxu0 %v245_v49  ;;  %v2202_v48 = vld [vmem:[#allocation5 + $0x158] sm:$0xff] }
  0x51   : > { %714 = vmatpush.bf16.msrb.mxu3 %v2186_v50  ;;  %870 = vmatpush.bf16.msrb.mxu0 %v2194_v51  ;;  %v2226_v49 = vld [vmem:[#allocation5 + $0x218] sm:$0xff]  ;;  %v192_v50 = vld [vmem:[%s2559_s19 + $0x30] sm:$0xff]  ;;  %v193_v51 = vld [vmem:[%s2559_s19 + $0x38] sm:$0xff] }
  0x52   : > { %v1875_v42 = vld [vmem:[%s2559_s19 + $0x82] sm:$0xff] }
  0x53   : > { %559 = vmatpush.bf16.msrb.mxu2 %v2177_v52  ;;  %419 = vmatpush.bf16.msrb.mxu1 %v2161_v53  ;;  %v1867_v52 = vld [vmem:[%s2559_s19 + $0x42] sm:$0xff]  ;;  %v1868_v53 = vld [vmem:[%s2559_s19 + $0x4a] sm:$0xff] }
  0x55   : > { %715 = vmatpush.bf16.msrb.mxu3 %v2185_v54  ;;  %871 = vmatpush.bf16.msrb.mxu0 %v2193_v55  ;;  %v1916_v54 = vld [vmem:[%s2559_s19 + $0x43] sm:$0xff]  ;;  %v1917_v55 = vld [vmem:[%s2559_s19 + $0x4b] sm:$0xff] }
  0x57   : > { %560 = vmatpush.bf16.msrb.mxu2 %v2176_v56  ;;  %420 = vmatpush.bf16.msrb.mxu1 %v2160_v57  ;;  %v205_v56 = vpack.c.bf16 %v193_v51, %v192_v50  ;;  %v640_v57 = vpack.c.bf16 %v1868_v53, %v1867_v52 }
  0x59   : > { %716 = vmatpush.bf16.msrb.mxu3 %v2184_v58  ;;  %872 = vmatpush.bf16.msrb.mxu0 %v2192_v59  ;;  %v796_v58 = vpack.c.bf16 %v1917_v55, %v1916_v54  ;;  %v2209_v59 = vld [vmem:[#allocation5 + $0x190] sm:$0xff] }
  0x5b   : > { %561 = vmatpush.bf16.msrb.mxu2 %v2175_v60  ;;  %421 = vmatpush.bf16.msrb.mxu1 %v2159_v61  ;;  %v2217_v60 = vld [vmem:[#allocation5 + $0x1d0] sm:$0xff] }
  0x5c   : > { %v2201_v61 = vld [vmem:[#allocation5 + $0x150] sm:$0xff] }
  0x5d   : > { %717 = vmatpush.bf16.msrb.mxu3 %v2183_v63  ;;  %873 = vmatpush.bf16.msrb.mxu0 %v2191_v0  ;;  %v194_v63 = vld [vmem:[%s2559_s19 + $0x40] sm:$0xff]  ;;  %v195_v0 = vld [vmem:[%s2559_s19 + $0x48] sm:$0xff] }
  0x5e   : > { %422 = vmatmul.bf16.vlgmr.msrb.gmra.mxu1 %v202_v12  ;;  %562 = vmatmul.bf16.vlgmr.msrb.gmra.mxu2 %v481_v13  ;;  %v206_v5 = vpack.c.bf16 %v195_v0, %v194_v63  ;;  %v196_v12 = vld [vmem:[%s2559_s19 + $0x50] sm:$0xff]  ;;  %v197_v13 = vld [vmem:[%s2559_s19 + $0x58] sm:$0xff]  ;;  %v2106_v63 = vld [vmem:[%s2559_s19 + $0x26] sm:$0xff] }
  0x5f   : > { %1178 = vmatpush.bf16.msra.mxu2 %v2214_v2  ;;  %1022 = vmatpush.bf16.msra.mxu1 %v2206_v3  ;;  %v1870_v2 = vld [vmem:[%s2559_s19 + $0x5a] sm:$0xff]  ;;  %v2107_v0 = vld [vmem:[%s2559_s19 + $0x2e] sm:$0xff] }
  0x60   : > { %718 = vmatmul.bf16.vlgmr.msrb.gmra.mxu3 %v637_v14  ;;  %874 = vmatmul.bf16.vlgmr.msrb.gmra.mxu0 %v793_v15  ;;  %v1918_v3 = vld [vmem:[%s2559_s19 + $0x53] sm:$0xff]  ;;  %v641_v6 = vpack.c.bf16 %v1870_v2, %v1869_v1  ;;  %v1872_v15 = vld [vmem:[%s2559_s19 + $0x6a] sm:$0xff] }
  0x61   : > { %1334 = vmatpush.bf16.msra.mxu3 %v2222_v10  ;;  %1490 = vmatpush.bf16.msra.mxu0 %v2230_v11  ;;  %v797_v7 = vpack.c.bf16 %v1919_v4, %v1918_v3  ;;  %v2200_v10 = vld [vmem:[#allocation5 + $0x148] sm:$0xff] }
  0x62   : > { %v2224_v11 = vld [vmem:[#allocation5 + $0x208] sm:$0xff] }
  0x63   : > { %1179 = vmatpush.bf16.msra.mxu2 %v2213_v16  ;;  %1023 = vmatpush.bf16.msra.mxu1 %v2205_v17  ;;  %v1920_v16 = vld [vmem:[%s2559_s19 + $0x63] sm:$0xff]  ;;  %v1921_v17 = vld [vmem:[%s2559_s19 + $0x6b] sm:$0xff] }
  0x65   : > { %1335 = vmatpush.bf16.msra.mxu3 %v2221_v18  ;;  %1491 = vmatpush.bf16.msra.mxu0 %v2229_v19  ;;  %v207_v18 = vpack.c.bf16 %v197_v13, %v196_v12 }
  0x67   : > { %1180 = vmatpush.bf16.msra.mxu2 %v2212_v20  ;;  %1024 = vmatpush.bf16.msra.mxu1 %v2204_v21  ;;  %v798_v20 = vpack.c.bf16 %v1921_v17, %v1920_v16  ;;  %v2207_v21 = vld [vmem:[#allocation5 + $0x180] sm:$0xff] }
  0x69   : > { %1336 = vmatpush.bf16.msra.mxu3 %v2220_v22  ;;  %1492 = vmatpush.bf16.msra.mxu0 %v2228_v23  ;;  %v2215_v22 = vld [vmem:[#allocation5 + $0x1c0] sm:$0xff] }
  0x6a   : > { %v2199_v23 = vld [vmem:[#allocation5 + $0x140] sm:$0xff] }
  0x6b   : > { %1181 = vmatpush.bf16.msra.mxu2 %v2211_v33  ;;  %1025 = vmatpush.bf16.msra.mxu1 %v2203_v35  ;;  %v643_v33 = vpack.c.bf16 %v1874_v28, %v1873_v27 }
  0x6d   : > { %1337 = vmatpush.bf16.msra.mxu3 %v2219_v34  ;;  %1493 = vmatpush.bf16.msra.mxu0 %v2227_v36 }
  0x6e   : > { %427 = vmatmul.bf16.gmra.mxu1 %v203_v30  ;;  %567 = vmatmul.bf16.gmra.mxu2 %v637_v14  ;;  %v1871_v14 = vld [vmem:[%s2559_s19 + $0x62] sm:$0xff] }
  0x6f   : > { %1182 = vmatpush.bf16.msra.mxu2 %v2210_v46  ;;  %1026 = vmatpush.bf16.msra.mxu1 %v2202_v48  ;;  %v642_v19 = vpack.c.bf16 %v1872_v15, %v1871_v14  ;;  %v1923_v30 = vld [vmem:[%s2559_s19 + $0x7b] sm:$0xff]  ;;  %v209_v48 = vpack.c.bf16 %v201_v41, %v200_v40 }
  0x70   : > { %723 = vmatmul.bf16.gmra.mxu3 %v638_v31  ;;  %879 = vmatmul.bf16.gmra.mxu0 %v794_v32  ;;  %v799_v34 = vpack.c.bf16 %v1923_v30, %v1922_v29 }
  0x71   : > { %1338 = vmatpush.bf16.msra.mxu3 %v2218_v47  ;;  %1494 = vmatpush.bf16.msra.mxu0 %v2226_v49 }
  0x73   : > { %1183 = vmatpush.bf16.msra.mxu2 %v2209_v59  ;;  %1027 = vmatpush.bf16.msra.mxu1 %v2201_v61  ;;  %v2008_v59 = vld [vmem:[%s2559_s19 + $0x24] sm:$0xff] }
  0x74   : > { %v2057_v61 = vld [vmem:[%s2559_s19 + $0x25] sm:$0xff] }
  0x75   : > { %1339 = vmatpush.bf16.msra.mxu3 %v2217_v60  ;;  %1495 = vmatpush.bf16.msra.mxu0 %v2225_v62  ;;  %v2009_v60 = vld [vmem:[%s2559_s19 + $0x2c] sm:$0xff] }
  0x76   : > { %v2058_v62 = vld [vmem:[%s2559_s19 + $0x2d] sm:$0xff]  ;;  %v1105_v4 = vpack.c.bf16 %v2009_v60, %v2008_v59 }
  0x77   : > { %1184 = vmatpush.bf16.msra.mxu2 %v2208_v8  ;;  %1028 = vmatpush.bf16.msra.mxu1 %v2200_v10  ;;  %v2111_v59 = vld [vmem:[%s2559_s19 + $0x4e] sm:$0xff] }
  0x79   : > { %1340 = vmatpush.bf16.msra.mxu3 %v2216_v9  ;;  %1496 = vmatpush.bf16.msra.mxu0 %v2224_v11 }
  0x7b   : > { %1185 = vmatpush.bf16.msra.mxu2 %v2207_v21  ;;  %1029 = vmatpush.bf16.msra.mxu1 %v2199_v23  ;;  %v2060_v21 = vld [vmem:[%s2559_s19 + $0x3d] sm:$0xff] }
  0x7c   : > { %v2109_v23 = vld [vmem:[%s2559_s19 + $0x3e] sm:$0xff] }
  0x7d   : > { %1341 = vmatpush.bf16.msra.mxu3 %v2215_v22  ;;  %1497 = vmatpush.bf16.msra.mxu0 %v2223_v24  ;;  %v2108_v22 = vld [vmem:[%s2559_s19 + $0x36] sm:$0xff] }
  0x7e   : > { %432 = vmatmul.bf16.gmra.mxu1 %v204_v43  ;;  %572 = vmatmul.bf16.gmra.mxu2 %v638_v31  ;;  %v208_v31 = vpack.c.bf16 %v199_v26, %v198_v25  ;;  %v1876_v43 = vld [vmem:[%s2559_s19 + $0x8a] sm:$0xff]  ;;  %v1418_v30 = vpack.c.bf16 %v2109_v23, %v2108_v22 }
  0x7f   : > { %v644_v50 = vpack.c.bf16 %v1876_v43, %v1875_v42 }
  0x80   : > { %728 = vmatmul.bf16.gmra.mxu3 %v639_v44  ;;  %884 = vmatmul.bf16.gmra.mxu0 %v795_v45  ;;  %v1925_v45 = vld [vmem:[%s2559_s19 + $0x8b] sm:$0xff] }
  0x8e   : > { %437 = vmatmul.bf16.gmra.mxu1 %v205_v56  ;;  %577 = vmatmul.bf16.gmra.mxu2 %v639_v44  ;;  %v1924_v44 = vld [vmem:[%s2559_s19 + $0x83] sm:$0xff] }
  0x8f   : > { %v800_v51 = vpack.c.bf16 %v1925_v45, %v1924_v44 }
  0x90   : > { %733 = vmatmul.bf16.gmra.mxu3 %v640_v57  ;;  %889 = vmatmul.bf16.gmra.mxu0 %v796_v58  ;;  %v1960_v58 = vld [vmem:[%s2559_s19 + $0x1c] sm:$0xff] }
  0x9e   : > { %442 = vmatmul.bf16.gmra.mxu1 %v206_v5  ;;  %582 = vmatmul.bf16.gmra.mxu2 %v640_v57  ;;  %v1959_v57 = vld [vmem:[%s2559_s19 + $0x14] sm:$0xff] }
  0x9f   : > { %v949_v3 = vpack.c.bf16 %v1960_v58, %v1959_v57  ;;  %v2062_v57 = vld [vmem:[%s2559_s19 + $0x4d] sm:$0xff] }
  0xa0   : > { %738 = vmatmul.bf16.gmra.mxu3 %v641_v6  ;;  %894 = vmatmul.bf16.gmra.mxu0 %v797_v7  ;;  %v1417_v7 = vpack.c.bf16 %v2107_v0, %v2106_v63  ;;  %v2110_v58 = vld [vmem:[%s2559_s19 + $0x46] sm:$0xff] }
  0xae   : > { %447 = vmatmul.bf16.gmra.mxu1 %v207_v18  ;;  %587 = vmatmul.bf16.gmra.mxu2 %v641_v6  ;;  %v1261_v6 = vpack.c.bf16 %v2058_v62, %v2057_v61  ;;  %v2010_v18 = vld [vmem:[%s2559_s19 + $0x34] sm:$0xff] }
  0xb0   : > { %743 = vmatmul.bf16.gmra.mxu3 %v642_v19  ;;  %899 = vmatmul.bf16.gmra.mxu0 %v798_v20  ;;  %v2059_v20 = vld [vmem:[%s2559_s19 + $0x35] sm:$0xff] }
  0xb1   : > { %v1262_v29 = vpack.c.bf16 %v2060_v21, %v2059_v20  ;;  %v2112_v20 = vld [vmem:[%s2559_s19 + $0x56] sm:$0xff]  ;;  %v2113_v21 = vld [vmem:[%s2559_s19 + $0x5e] sm:$0xff] }
  0xbb   : > { %v2621_v32 = vpop.f32.mrf.mxu1 }
  0xbd   : > { %v326_v35 = vpop.f32.mrf.mxu0 }
  0xbe   : > { %452 = vmatmul.bf16.gmra.mxu1 %v208_v31  ;;  %592 = vmatmul.bf16.gmra.mxu2 %v642_v19  ;;  %v2011_v19 = vld [vmem:[%s2559_s19 + $0x3c] sm:$0xff] }
  0xbf   : > { %v1106_v27 = vpack.c.bf16 %v2011_v19, %v2010_v18  ;;  %v2063_v18 = vld [vmem:[%s2559_s19 + $0x55] sm:$0xff]  ;;  %v2064_v19 = vld [vmem:[%s2559_s19 + $0x5d] sm:$0xff] }
  0xc0   : > { %748 = vmatmul.bf16.gmra.mxu3 %v643_v33  ;;  %904 = vmatmul.bf16.gmra.mxu0 %v799_v34 }
  0xc1   : > { %v2623_v36 = vpop.f32.mrf.mxu2 }
  0xc3   : > { %v2625_v37 = vpop.f32.mrf.mxu3  ;;  %v2627_v38 = vpop.f32.mrf.mxu1 }
  0xc5   : > { %v328_v39 = vpop.f32.mrf.mxu0 }
  0xc9   : > { %v2635_v46 = vpop.f32.mrf.mxu2 }
  0xcb   : > { %v2637_v47 = vpop.f32.mrf.mxu3  ;;  %v2639_v49 = vpop.f32.mrf.mxu1 }
  0xcd   : > { %v331_v52 = vpop.f32.mrf.mxu0 }
  0xce   : > { %457 = vmatmul.bf16.gmra.mxu1 %v209_v48  ;;  %597 = vmatmul.bf16.gmra.mxu2 %v643_v33 }
  0xd0   : > { %753 = vmatmul.bf16.gmra.mxu3 %v644_v50  ;;  %909 = vmatmul.bf16.gmra.mxu0 %v800_v51  ;;  %v2012_v50 = vld [vmem:[%s2559_s19 + $0x44] sm:$0xff]  ;;  %v2013_v51 = vld [vmem:[%s2559_s19 + $0x4c] sm:$0xff] }
  0xd1   : > { %v2641_v53 = vpop.f32.mrf.mxu2  ;;  %v1107_v63 = vpack.c.bf16 %v2013_v51, %v2012_v50  ;;  %v2065_v50 = vld [vmem:[%s2559_s19 + $0x65] sm:$0xff]  ;;  %v2066_v51 = vld [vmem:[%s2559_s19 + $0x6d] sm:$0xff] }
  0xd3   : > { %v2643_v54 = vpop.f32.mrf.mxu3  ;;  %v2645_v55 = vpop.f32.mrf.mxu1 }
  0xd5   : > { %v333_v56 = vpop.f32.mrf.mxu0 }
  0xd9   : > { %v2655_v1 = vpop.f32.mrf.mxu2 }
  0xdb   : > { %v2657_v2 = vpop.f32.mrf.mxu3  ;;  %v423_v5 = vpop.f32.mrf.mxu1 }
  0xdc   : > { %v424_v8 = vadd.f32 %v423_v5, %v326_v35 }
  0xdd   : > { %v875_v9 = vpop.f32.mrf.mxu0 }
  0xde   : > { %1030 = vmatmul.bf16.vlgmr.msra.gmra.mxu1 %v949_v3  ;;  %1186 = vmatmul.bf16.vlgmr.msra.gmra.mxu2 %v1105_v4 }
  0xe0   : > { %1342 = vmatmul.bf16.vlgmr.msra.gmra.mxu3 %v1261_v6  ;;  %1498 = vmatmul.bf16.vlgmr.msra.gmra.mxu0 %v1417_v7 }
  0xe1   : > { %v563_v10 = vpop.f32.mrf.mxu2 }
  0xe2   : > { %v603_v11 = vadd.f32 %v563_v10, %v424_v8 }
  0xe3   : > { %v719_v12 = vpop.f32.mrf.mxu3  ;;  %v425_v13 = vpop.f32.mrf.mxu1 }
  0xe4   : > { %v759_v14 = vadd.f32 %v719_v12, %v603_v11  ;;  %v426_v15 = vadd.f32 %v425_v13, %v328_v39 }
  0xe5   : > { %v877_v16 = vpop.f32.mrf.mxu0 }
  0xe6   : > { %v2659_v17 = vadd.f32 %v875_v9, %v759_v14 }
  0xe9   : > { %v565_v24 = vpop.f32.mrf.mxu2 }
  0xea   : > { %v604_v25 = vadd.f32 %v565_v24, %v426_v15  ;;  %v2014_v15 = vld [vmem:[%s2559_s19 + $0x54] sm:$0xff] }
  0xeb   : > { %v721_v26 = vpop.f32.mrf.mxu3  ;;  %v428_v28 = vpop.f32.mrf.mxu1 }
  0xec   : > { %v760_v31 = vadd.f32 %v721_v26, %v604_v25  ;;  %v429_v33 = vadd.f32 %v428_v28, %v331_v52  ;;  %v2061_v52 = vld [vmem:[%s2559_s19 + $0x45] sm:$0xff]  ;;  %v1420_v28 = vpack.c.bf16 %v2113_v21, %v2112_v20 }
  0xed   : > { %v880_v34 = vpop.f32.mrf.mxu0  ;;  %v1263_v3 = vpack.c.bf16 %v2062_v57, %v2061_v52  ;;  %v2114_v52 = vld [vmem:[%s2559_s19 + $0x66] sm:$0xff]  ;;  %v2115_v57 = vld [vmem:[%s2559_s19 + $0x6e] sm:$0xff]  ;;  %v2117_v20 = vld [vmem:[%s2559_s19 + $0x7e] sm:$0xff] }
  0xee   : > { %1035 = vmatmul.bf16.gmra.mxu1 %v1105_v4  ;;  %1191 = vmatmul.bf16.gmra.mxu2 %v1106_v27  ;;  %v2667_v35 = vadd.f32 %v877_v16, %v760_v31  ;;  %v1419_v4 = vpack.c.bf16 %v2111_v59, %v2110_v58  ;;  %v2015_v16 = vld [vmem:[%s2559_s19 + $0x5c] sm:$0xff] }
  0xef   : > { %v1108_v25 = vpack.c.bf16 %v2015_v16, %v2014_v15  ;;  %v2067_v15 = vld [vmem:[%s2559_s19 + $0x75] sm:$0xff] }
  0xf0   : > { %1347 = vmatmul.bf16.gmra.mxu3 %v1262_v29  ;;  %1503 = vmatmul.bf16.gmra.mxu0 %v1418_v30 }
  0xf1   : > { %v568_v39 = vpop.f32.mrf.mxu2 }
  0xf2   : > { %v605_v40 = vadd.f32 %v568_v39, %v429_v33 }
  0xf3   : > { %v724_v41 = vpop.f32.mrf.mxu3  ;;  %v430_v42 = vpop.f32.mrf.mxu1 }
  0xf4   : > { %v761_v43 = vadd.f32 %v724_v41, %v605_v40  ;;  %v431_v44 = vadd.f32 %v430_v42, %v333_v56 }
  0xf5   : > { %v882_v45 = vpop.f32.mrf.mxu0 }
  0xf6   : > { %v2669_v48 = vadd.f32 %v880_v34, %v761_v43 }
  0xf9   : > { %v570_v60 = vpop.f32.mrf.mxu2 }
  0xfa   : > { %v606_v61 = vadd.f32 %v570_v60, %v431_v44  ;;  %v2016_v44 = vld [vmem:[%s2559_s19 + $0x64] sm:$0xff] }
  0xfb   : > { %v726_v62 = vpop.f32.mrf.mxu3  ;;  %v433_v0 = vpop.f32.mrf.mxu1 }
  0xfc   : > { %v762_v5 = vadd.f32 %v726_v62, %v606_v61  ;;  %v434_v56 = vadd.f32 %v433_v0, %v2621_v32  ;;  %v1421_v0 = vpack.c.bf16 %v2115_v57, %v2114_v52  ;;  %v2119_v52 = vld [vmem:[%s2559_s19 + $0x8e] sm:$0xff] }
  0xfd   : > { %v885_v6 = vpop.f32.mrf.mxu0 }
  0xfe   : > { %1040 = vmatmul.bf16.gmra.mxu1 %v1106_v27  ;;  %1196 = vmatmul.bf16.gmra.mxu2 %v1107_v63  ;;  %v2678_v7 = vadd.f32 %v882_v45, %v762_v5  ;;  %v1264_v27 = vpack.c.bf16 %v2064_v19, %v2063_v18  ;;  %v2017_v45 = vld [vmem:[%s2559_s19 + $0x6c] sm:$0xff]  ;;  %v2068_v18 = vld [vmem:[%s2559_s19 + $0x7d] sm:$0xff] }
  0xff   : > { %v1109_v61 = vpack.c.bf16 %v2017_v45, %v2016_v44  ;;  %v2116_v19 = vld [vmem:[%s2559_s19 + $0x76] sm:$0xff]  ;;  %v2069_v44 = vld [vmem:[%s2559_s19 + $0x85] sm:$0xff] }
 0x100   : > { %1352 = vmatmul.bf16.gmra.mxu3 %v1263_v3  ;;  %1508 = vmatmul.bf16.gmra.mxu0 %v1419_v4 }
 0x101   : > { %v573_v8 = vpop.f32.mrf.mxu2 }
 0x102   : > { %v607_v9 = vadd.f32 %v573_v8, %v434_v56 }
 0x103   : > { %v729_v10 = vpop.f32.mrf.mxu3  ;;  %v435_v11 = vpop.f32.mrf.mxu1 }
 0x104   : > { %v763_v12 = vadd.f32 %v729_v10, %v607_v9  ;;  %v436_v13 = vadd.f32 %v435_v11, %v2627_v38 }
 0x105   : > { %v887_v32 = vpop.f32.mrf.mxu0 }
 0x106   : > { %v2681_v14 = vadd.f32 %v885_v6, %v763_v12 }
 0x109   : > { %v575_v22 = vpop.f32.mrf.mxu2 }
 0x10a   : > { %v608_v23 = vadd.f32 %v575_v22, %v436_v13  ;;  %v2018_v13 = vld [vmem:[%s2559_s19 + $0x74] sm:$0xff] }
 0x10b   : > { %v731_v24 = vpop.f32.mrf.mxu3  ;;  %v438_v26 = vpop.f32.mrf.mxu1 }
 0x10c   : > { %v764_v29 = vadd.f32 %v731_v24, %v608_v23  ;;  %v439_v38 = vadd.f32 %v438_v26, %v2639_v49  ;;  %v1422_v26 = vpack.c.bf16 %v2117_v20, %v2116_v19  ;;  %v2121_v19 = vld [vmem:[%s2559_s19 + $0x9e] sm:$0xff] }
 0x10d   : > { %v890_v30 = vpop.f32.mrf.mxu0 }
 0x10e   : > { %1045 = vmatmul.bf16.gmra.mxu1 %v1107_v63  ;;  %1201 = vmatmul.bf16.gmra.mxu2 %v1108_v25  ;;  %v2690_v31 = vadd.f32 %v887_v32, %v764_v29  ;;  %v1265_v63 = vpack.c.bf16 %v2066_v51, %v2065_v50  ;;  %v2019_v32 = vld [vmem:[%s2559_s19 + $0x7c] sm:$0xff]  ;;  %v2070_v50 = vld [vmem:[%s2559_s19 + $0x8d] sm:$0xff] }
 0x10f   : > { %v2118_v51 = vld [vmem:[%s2559_s19 + $0x86] sm:$0xff] }
 0x110   : > { %1357 = vmatmul.bf16.gmra.mxu3 %v1264_v27  ;;  %1513 = vmatmul.bf16.gmra.mxu0 %v1420_v28 }
 0x111   : > { %v578_v33 = vpop.f32.mrf.mxu2 }
 0x112   : > { %v609_v34 = vadd.f32 %v578_v33, %v439_v38 }
 0x113   : > { %v734_v39 = vpop.f32.mrf.mxu3  ;;  %v440_v40 = vpop.f32.mrf.mxu1 }
 0x114   : > { %v765_v41 = vadd.f32 %v734_v39, %v609_v34  ;;  %v441_v42 = vadd.f32 %v440_v40, %v2645_v55 }
 0x115   : > { %v892_v49 = vpop.f32.mrf.mxu0 }
 0x116   : > { %v2693_v43 = vadd.f32 %v890_v30, %v765_v41 }
 0x119   : > { %v580_v58 = vpop.f32.mrf.mxu2 }
 0x11a   : > { %v610_v59 = vadd.f32 %v580_v58, %v441_v42  ;;  %v2020_v42 = vld [vmem:[%s2559_s19 + $0x84] sm:$0xff] }
 0x11b   : > { %v736_v60 = vpop.f32.mrf.mxu3  ;;  %v443_v62 = vpop.f32.mrf.mxu1 }
 0x11c   : > { %v766_v3 = vadd.f32 %v736_v60, %v610_v59  ;;  %v444_v5 = vadd.f32 %v443_v62, %v2623_v36  ;;  %v1110_v36 = vpack.c.bf16 %v2019_v32, %v2018_v13  ;;  %v1423_v62 = vpack.c.bf16 %v2119_v52, %v2118_v51  ;;  %v2023_v13 = vld [vmem:[%s2559_s19 + $0x9c] sm:$0xff] }
 0x11d   : > { %v895_v55 = vpop.f32.mrf.mxu0  ;;  %v2071_v32 = vld [vmem:[%s2559_s19 + $0x95] sm:$0xff] }
 0x11e   : > { %1050 = vmatmul.bf16.gmra.mxu1 %v1108_v25  ;;  %1206 = vmatmul.bf16.gmra.mxu2 %v1109_v61  ;;  %v2701_v4 = vadd.f32 %v892_v49, %v766_v3  ;;  %v1266_v25 = vpack.c.bf16 %v2068_v18, %v2067_v15  ;;  %v2021_v49 = vld [vmem:[%s2559_s19 + $0x8c] sm:$0xff]  ;;  %v2120_v18 = vld [vmem:[%s2559_s19 + $0x96] sm:$0xff] }
 0x120   : > { %1362 = vmatmul.bf16.gmra.mxu3 %v1265_v63  ;;  %1518 = vmatmul.bf16.gmra.mxu0 %v1421_v0 }
 0x121   : > { %v583_v56 = vpop.f32.mrf.mxu2 }
 0x122   : > { %v611_v6 = vadd.f32 %v583_v56, %v444_v5 }
 0x123   : > { %v739_v8 = vpop.f32.mrf.mxu3  ;;  %v445_v9 = vpop.f32.mrf.mxu1 }
 0x124   : > { %v767_v10 = vadd.f32 %v739_v8, %v611_v6  ;;  %v446_v16 = vadd.f32 %v445_v9, %v2635_v46 }
 0x125   : > { %v897_v11 = vpop.f32.mrf.mxu0 }
 0x126   : > { %v2704_v12 = vadd.f32 %v895_v55, %v767_v10 }
 0x129   : > { %v585_v21 = vpop.f32.mrf.mxu2 }
 0x12a   : > { %v612_v22 = vadd.f32 %v585_v21, %v446_v16  ;;  %v2072_v16 = vld [vmem:[%s2559_s19 + $0x9d] sm:$0xff] }
 0x12b   : > { %v741_v23 = vpop.f32.mrf.mxu3  ;;  %v448_v24 = vpop.f32.mrf.mxu1 }
 0x12c   : > { %v768_v27 = vadd.f32 %v741_v23, %v612_v22  ;;  %v449_v46 = vadd.f32 %v448_v24, %v2641_v53  ;;  %v1111_v53 = vpack.c.bf16 %v2021_v49, %v2020_v42  ;;  %v1424_v24 = vpack.c.bf16 %v2121_v19, %v2120_v18 }
 0x12d   : > { %v900_v28 = vpop.f32.mrf.mxu0 }
 0x12e   : > { %1055 = vmatmul.bf16.gmra.mxu1 %v1109_v61  ;;  %1211 = vmatmul.bf16.gmra.mxu2 %v1110_v36  ;;  %v2713_v29 = vadd.f32 %v897_v11, %v768_v27  ;;  %v1267_v61 = vpack.c.bf16 %v2070_v50, %v2069_v44  ;;  %v2022_v11 = vld [vmem:[%s2559_s19 + $0x94] sm:$0xff] }
 0x130   : > { %1367 = vmatmul.bf16.gmra.mxu3 %v1266_v25  ;;  %1523 = vmatmul.bf16.gmra.mxu0 %v1422_v26 }
 0x131   : > { %v588_v38 = vpop.f32.mrf.mxu2 }
 0x132   : > { %v613_v30 = vadd.f32 %v588_v38, %v449_v46 }
 0x133   : > { %v744_v33 = vpop.f32.mrf.mxu3  ;;  %v450_v34 = vpop.f32.mrf.mxu1 }
 0x134   : > { %v769_v39 = vadd.f32 %v744_v33, %v613_v30  ;;  %v451_v45 = vadd.f32 %v450_v34, %v2655_v1 }
 0x135   : > { %v902_v40 = vpop.f32.mrf.mxu0 }
 0x136   : > { %v2716_v41 = vadd.f32 %v900_v28, %v769_v39 }
 0x139   : > { %v590_v57 = vpop.f32.mrf.mxu2 }
 0x13a   : > { %v614_v58 = vadd.f32 %v590_v57, %v451_v45 }
 0x13b   : > { %v746_v59 = vpop.f32.mrf.mxu3  ;;  %v453_v60 = vpop.f32.mrf.mxu1 }
 0x13c   : > { %v770_v63 = vadd.f32 %v746_v59, %v614_v58  ;;  %v454_v1 = vadd.f32 %v453_v60, %v2625_v37  ;;  %v1112_v37 = vpack.c.bf16 %v2023_v13, %v2022_v11 }
 0x13d   : > { %v905_v0 = vpop.f32.mrf.mxu0 }
 0x13e   : > { %1060 = vmatmul.bf16.gmra.mxu1 %v1110_v36  ;;  %1216 = vmatmul.bf16.gmra.mxu2 %v1111_v53  ;;  %v2725_v3 = vadd.f32 %v902_v40, %v770_v63  ;;  %v1268_v36 = vpack.c.bf16 %v2072_v16, %v2071_v32 }
 0x140   : > { %1372 = vmatmul.bf16.gmra.mxu3 %v1267_v61  ;;  %1528 = vmatmul.bf16.gmra.mxu0 %v1423_v62 }
 0x141   : > { %v593_v55 = vpop.f32.mrf.mxu2 }
 0x142   : > { %v615_v5 = vadd.f32 %v593_v55, %v454_v1 }
 0x143   : > { %v749_v56 = vpop.f32.mrf.mxu3  ;;  %v455_v6 = vpop.f32.mrf.mxu1 }
 0x144   : > { %v771_v8 = vadd.f32 %v749_v56, %v615_v5  ;;  %v456_v15 = vadd.f32 %v455_v6, %v2637_v47 }
 0x145   : > { %v907_v9 = vpop.f32.mrf.mxu0 }
 0x146   : > { %v2728_v10 = vadd.f32 %v905_v0, %v771_v8 }
 0x149   : > { %v595_v20 = vpop.f32.mrf.mxu2 }
 0x14a   : > { %v616_v21 = vadd.f32 %v595_v20, %v456_v15 }
 0x14b   : > { %v751_v22 = vpop.f32.mrf.mxu3  ;;  %v458_v23 = vpop.f32.mrf.mxu1 }
 0x14c   : > { %v772_v25 = vadd.f32 %v751_v22, %v616_v21  ;;  %v459_v47 = vadd.f32 %v458_v23, %v2643_v54 }
 0x14d   : > { %v910_v26 = vpop.f32.mrf.mxu0 }
 0x14e   : > { %1065 = vmatmul.bf16.gmra.mxu1 %v1111_v53  ;;  %1221 = vmatmul.bf16.gmra.mxu2 %v1112_v37  ;;  %v2737_v27 = vadd.f32 %v907_v9, %v772_v25 }
 0x150   : > { %1377 = vmatmul.bf16.gmra.mxu3 %v1268_v36  ;;  %1533 = vmatmul.bf16.gmra.mxu0 %v1424_v24 }
 0x151   : > { %v598_v28 = vpop.f32.mrf.mxu2 }
 0x152   : > { %v617_v46 = vadd.f32 %v598_v28, %v459_v47 }
 0x153   : > { %v754_v38 = vpop.f32.mrf.mxu3  ;;  %v460_v30 = vpop.f32.mrf.mxu1 }
 0x154   : > { %v773_v33 = vadd.f32 %v754_v38, %v617_v46  ;;  %v461_v40 = vadd.f32 %v460_v30, %v2657_v2  ;;  %v2750_v2 = vld [vmem:[%s2840_s2] ss:$0 sm:$0xff] }
 0x155   : > { %v912_v34 = vpop.f32.mrf.mxu0 }
 0x156   : > { %v2740_v39 = vadd.f32 %v910_v26, %v773_v33 }
 0x159   : > { %v600_v42 = vpop.f32.mrf.mxu2 }
 0x15a   : > { %v618_v49 = vadd.f32 %v600_v42, %v461_v40 }
 0x15b   : > { %v756_v44 = vpop.f32.mrf.mxu3  ;;  %v1031_v45 = vpop.f32.mrf.mxu1 }
 0x15c   : > { %v774_v50 = vadd.f32 %v756_v44, %v618_v49  ;;  %v1071_v54 = vadd.f32 %v1031_v45, %v2659_v17 }
 0x15d   : > { %v1499_v51 = vpop.f32.mrf.mxu0 }
 0x15e   : > { %v2743_v52 = vadd.f32 %v912_v34, %v774_v50 }
 0x161   : > { %v1187_v57 = vpop.f32.mrf.mxu2 }
 0x162   : > { %v1227_v58 = vadd.f32 %v1187_v57, %v1071_v54 }
 0x163   : > { %v1343_v59 = vpop.f32.mrf.mxu3  ;;  %v1033_v53 = vpop.f32.mrf.mxu1 }
 0x164   : > { %v1383_v60 = vadd.f32 %v1343_v59, %v1227_v58  ;;  %v1072_v0 = vadd.f32 %v1033_v53, %v2667_v35 }
 0x165   : > { %v1501_v61 = vpop.f32.mrf.mxu0 }
 0x166   : > { %v1539_v62 = vadd.f32 %v1499_v51, %v1383_v60 }
 0x168   : > { %v1559_v63 = vadd.f32 %v2750_v2, %v1539_v62 }
 0x169   : > { %v1189_v17 = vpop.f32.mrf.mxu2 }
 0x16a   : > { %v1575_v1 = vmax.f32 %v1559_v63, 0.0  ;;  %v1228_v55 = vadd.f32 %v1189_v17, %v1072_v0 }
 0x16b   : > { %v1345_v5 = vpop.f32.mrf.mxu3  ;;  %v1036_v56 = vpop.f32.mrf.mxu1 }
 0x16c   : > { %1591 = vst [vmem:[%s2756_s27] sm:$0xff] %v1575_v1  ;;  %v1384_v6 = vadd.f32 %v1345_v5, %v1228_v55  ;;  %v1073_v13 = vadd.f32 %v1036_v56, %v2669_v48 }
 0x16d   : > { %v1504_v8 = vpop.f32.mrf.mxu0 }
 0x16e   : > { %v1540_v9 = vadd.f32 %v1501_v61, %v1384_v6 }
 0x170   : > { %v1560_v11 = vadd.f32 %v2750_v2, %v1540_v9 }
 0x171   : > { %v1192_v32 = vpop.f32.mrf.mxu2 }
 0x172   : > { %v1576_v35 = vmax.f32 %v1560_v11, 0.0  ;;  %v1229_v15 = vadd.f32 %v1192_v32, %v1073_v13 }
 0x173   : > { %v1348_v16 = vpop.f32.mrf.mxu3  ;;  %v1038_v18 = vpop.f32.mrf.mxu1 }
 0x174   : > { %1592 = vst [vmem:[%s2756_s27 + $0x8] sm:$0xff] %v1576_v35  ;;  %v1385_v19 = vadd.f32 %v1348_v16, %v1229_v15  ;;  %v1074_v37 = vadd.f32 %v1038_v18, %v2678_v7 }
 0x175   : > { %v1506_v20 = vpop.f32.mrf.mxu0 }
 0x176   : > { %v1541_v21 = vadd.f32 %v1504_v8, %v1385_v19 }
 0x178   : > { %v1561_v22 = vadd.f32 %v2750_v2, %v1541_v21 }
 0x179   : > { %v1194_v23 = vpop.f32.mrf.mxu2 }
 0x17a   : > { %v1577_v36 = vmax.f32 %v1561_v22, 0.0  ;;  %v1230_v24 = vadd.f32 %v1194_v23, %v1074_v37 }
 0x17b   : > { %v1350_v25 = vpop.f32.mrf.mxu3  ;;  %v1041_v48 = vpop.f32.mrf.mxu1 }
 0x17c   : > { %1593 = vst [vmem:[%s2756_s27 + $0x10] sm:$0xff] %v1577_v36  ;;  %v1386_v26 = vadd.f32 %v1350_v25, %v1230_v24  ;;  %v1075_v38 = vadd.f32 %v1041_v48, %v2681_v14 }
 0x17d   : > { %v1509_v47 = vpop.f32.mrf.mxu0 }
 0x17e   : > { %v1542_v28 = vadd.f32 %v1506_v20, %v1386_v26 }
 0x180   : > { %v1562_v46 = vadd.f32 %v2750_v2, %v1542_v28 }
 0x181   : > { %v1197_v30 = vpop.f32.mrf.mxu2 }
 0x182   : > { %v1578_v33 = vmax.f32 %v1562_v46, 0.0  ;;  %v1231_v34 = vadd.f32 %v1197_v30, %v1075_v38 }
 0x183   : > { %v1353_v40 = vpop.f32.mrf.mxu3  ;;  %v1043_v7 = vpop.f32.mrf.mxu1 }
 0x184   : > { %1594 = vst [vmem:[%s2756_s27 + $0x18] sm:$0xff] %v1578_v33  ;;  %v1387_v42 = vadd.f32 %v1353_v40, %v1231_v34  ;;  %v1076_v50 = vadd.f32 %v1043_v7, %v2690_v31 }
 0x185   : > { %v1511_v49 = vpop.f32.mrf.mxu0 }
 0x186   : > { %v1543_v44 = vadd.f32 %v1509_v47, %v1387_v42 }
 0x188   : > { %v1563_v45 = vadd.f32 %v2750_v2, %v1543_v44 }
 0x189   : > { %v1199_v51 = vpop.f32.mrf.mxu2 }
 0x18a   : > { %v1579_v54 = vmax.f32 %v1563_v45, 0.0  ;;  %v1232_v57 = vadd.f32 %v1199_v51, %v1076_v50 }
 0x18b   : > { %v1355_v58 = vpop.f32.mrf.mxu3  ;;  %v1046_v14 = vpop.f32.mrf.mxu1 }
 0x18c   : > { %1595 = vst [vmem:[%s2756_s27 + $0x20] sm:$0xff] %v1579_v54  ;;  %v1388_v59 = vadd.f32 %v1355_v58, %v1232_v57  ;;  %v1077_v62 = vadd.f32 %v1046_v14, %v2693_v43 }
 0x18d   : > { %v1514_v53 = vpop.f32.mrf.mxu0 }
 0x18e   : > { %v1544_v60 = vadd.f32 %v1511_v49, %v1388_v59 }
 0x190   : > { %v1564_v61 = vadd.f32 %v2750_v2, %v1544_v60 }
 0x191   : > { %v1202_v63 = vpop.f32.mrf.mxu2 }
 0x192   : > { %v1580_v0 = vmax.f32 %v1564_v61, 0.0  ;;  %v1233_v17 = vadd.f32 %v1202_v63, %v1077_v62 }
 0x193   : > { %v1358_v1 = vpop.f32.mrf.mxu3  ;;  %v1048_v31 = vpop.f32.mrf.mxu1 }
 0x194   : > { %1596 = vst [vmem:[%s2756_s27 + $0x28] sm:$0xff] %v1580_v0  ;;  %v1389_v55 = vadd.f32 %v1358_v1, %v1233_v17  ;;  %v1078_v8 = vadd.f32 %v1048_v31, %v2701_v4 }
 0x195   : > { %v1516_v5 = vpop.f32.mrf.mxu0 }
 0x196   : > { %v1545_v56 = vadd.f32 %v1514_v53, %v1389_v55 }
 0x198   : > { %v1565_v6 = vadd.f32 %v2750_v2, %v1545_v56 }
 0x199   : > { %v1204_v9 = vpop.f32.mrf.mxu2 }
 0x19a   : > { %v1581_v11 = vmax.f32 %v1565_v6, 0.0  ;;  %v1234_v13 = vadd.f32 %v1204_v9, %v1078_v8 }
 0x19b   : > { %v1360_v32 = vpop.f32.mrf.mxu3  ;;  %v1051_v43 = vpop.f32.mrf.mxu1 }
 0x19c   : > { %1597 = vst [vmem:[%s2756_s27 + $0x30] sm:$0xff] %v1581_v11  ;;  %v1390_v35 = vadd.f32 %v1360_v32, %v1234_v13  ;;  %v1079_v19 = vadd.f32 %v1051_v43, %v2704_v12 }
 0x19d   : > { %v1519_v15 = vpop.f32.mrf.mxu0 }
 0x19e   : > { %v1546_v16 = vadd.f32 %v1516_v5, %v1390_v35 }
 0x1a0   : > { %v1566_v18 = vadd.f32 %v2750_v2, %v1546_v16 }
 0x1a1   : > { %v1207_v20 = vpop.f32.mrf.mxu2 }
 0x1a2   : > { %v1582_v21 = vmax.f32 %v1566_v18, 0.0  ;;  %v1235_v22 = vadd.f32 %v1207_v20, %v1079_v19 }
 0x1a3   : > { %v1363_v37 = vpop.f32.mrf.mxu3  ;;  %v1053_v4 = vpop.f32.mrf.mxu1 }
 0x1a4   : > { %1598 = vst [vmem:[%s2756_s27 + $0x38] sm:$0xff] %v1582_v21  ;;  %v1391_v23 = vadd.f32 %v1363_v37, %v1235_v22  ;;  %v1080_v48 = vadd.f32 %v1053_v4, %v2713_v29 }
 0x1a5   : > { %v1521_v36 = vpop.f32.mrf.mxu0 }
 0x1a6   : > { %v1547_v24 = vadd.f32 %v1519_v15, %v1391_v23 }
 0x1a8   : > { %v1567_v25 = vadd.f32 %v2750_v2, %v1547_v24 }
 0x1a9   : > { %v1209_v26 = vpop.f32.mrf.mxu2 }
 0x1aa   : > { %v1583_v47 = vmax.f32 %v1567_v25, 0.0  ;;  %v1236_v28 = vadd.f32 %v1209_v26, %v1080_v48 }
 0x1ab   : > { %v1365_v46 = vpop.f32.mrf.mxu3  ;;  %v1056_v12 = vpop.f32.mrf.mxu1 }
 0x1ac   : > { %1599 = vst [vmem:[%s2756_s27 + $0x40] sm:$0xff] %v1583_v47  ;;  %v1392_v38 = vadd.f32 %v1365_v46, %v1236_v28  ;;  %v1081_v40 = vadd.f32 %v1056_v12, %v2716_v41 }
 0x1ad   : > { %v1524_v30 = vpop.f32.mrf.mxu0 }
 0x1ae   : > { %v1548_v33 = vadd.f32 %v1521_v36, %v1392_v38 }
 0x1b0   : > { %v1568_v34 = vadd.f32 %v2750_v2, %v1548_v33 }
 0x1b1   : > { %v1212_v7 = vpop.f32.mrf.mxu2 }
 0x1b2   : > { %v1584_v42 = vmax.f32 %v1568_v34, 0.0  ;;  %v1237_v49 = vadd.f32 %v1212_v7, %v1081_v40 }
 0x1b3   : > { %v1368_v44 = vpop.f32.mrf.mxu3  ;;  %v1058_v29 = vpop.f32.mrf.mxu1 }
 0x1b4   : > { %1600 = vst [vmem:[%s2756_s27 + $0x48] sm:$0xff] %v1584_v42  ;;  %v1393_v45 = vadd.f32 %v1368_v44, %v1237_v49  ;;  %v1082_v57 = vadd.f32 %v1058_v29, %v2725_v3 }
 0x1b5   : > { %v1526_v50 = vpop.f32.mrf.mxu0 }
 0x1b6   : > { %v1549_v51 = vadd.f32 %v1524_v30, %v1393_v45 }
 0x1b8   : > { %v1569_v54 = vadd.f32 %v2750_v2, %v1549_v51 }
 0x1b9   : > { %v1214_v58 = vpop.f32.mrf.mxu2 }
 0x1ba   : > { %v1585_v14 = vmax.f32 %v1569_v54, 0.0  ;;  %v1238_v59 = vadd.f32 %v1214_v58, %v1082_v57 }
 0x1bb   : > { %v1370_v53 = vpop.f32.mrf.mxu3  ;;  %v1061_v41 = vpop.f32.mrf.mxu1 }
 0x1bc   : > { %1601 = vst [vmem:[%s2756_s27 + $0x50] sm:$0xff] %v1585_v14  ;;  %v1394_v60 = vadd.f32 %v1370_v53, %v1238_v59  ;;  %v1083_v0 = vadd.f32 %v1061_v41, %v2728_v10 }
 0x1bd   : > { %v1529_v62 = vpop.f32.mrf.mxu0 }
 0x1be   : > { %v1550_v61 = vadd.f32 %v1526_v50, %v1394_v60 }
 0x1c0   : > { %v1570_v63 = vadd.f32 %v2750_v2, %v1550_v61 }
 0x1c1   : > { %v1217_v17 = vpop.f32.mrf.mxu2 }
 0x1c2   : > { %v1586_v1 = vmax.f32 %v1570_v63, 0.0  ;;  %v1239_v31 = vadd.f32 %v1217_v17, %v1083_v0 }
 0x1c3   : > { %v1373_v55 = vpop.f32.mrf.mxu3  ;;  %v1063_v3 = vpop.f32.mrf.mxu1 }
 0x1c4   : > { %1602 = vst [vmem:[%s2756_s27 + $0x58] sm:$0xff] %v1586_v1  ;;  %v1395_v5 = vadd.f32 %v1373_v55, %v1239_v31  ;;  %v1084_v8 = vadd.f32 %v1063_v3, %v2737_v27 }
 0x1c5   : > { %v1531_v9 = vpop.f32.mrf.mxu0 }
 0x1c6   : > { %v1551_v56 = vadd.f32 %v1529_v62, %v1395_v5 }
 0x1c8   : > { %v1571_v6 = vadd.f32 %v2750_v2, %v1551_v56 }
 0x1c9   : > { %v1219_v11 = vpop.f32.mrf.mxu2 }
 0x1ca   : > { %v1587_v13 = vmax.f32 %v1571_v6, 0.0  ;;  %v1240_v32 = vadd.f32 %v1219_v11, %v1084_v8 }
 0x1cb   : > { %v1375_v43 = vpop.f32.mrf.mxu3  ;;  %v1066_v10 = vpop.f32.mrf.mxu1 }
 0x1cc   : > { %1603 = vst [vmem:[%s2756_s27 + $0x60] sm:$0xff] %v1587_v13  ;;  %v1396_v35 = vadd.f32 %v1375_v43, %v1240_v32  ;;  %v1085_v18 = vadd.f32 %v1066_v10, %v2740_v39 }
 0x1cd   : > { %v1534_v22 = vpop.f32.mrf.mxu0 }
 0x1ce   : > { %v1552_v15 = vadd.f32 %v1531_v9, %v1396_v35 }
 0x1d0   : > { %v1572_v16 = vadd.f32 %v2750_v2, %v1552_v15 }
 0x1d1   : > { %v1222_v19 = vpop.f32.mrf.mxu2 }
 0x1d2   : > { %v1588_v20 = vmax.f32 %v1572_v16, 0.0  ;;  %v1241_v21 = vadd.f32 %v1222_v19, %v1085_v18 }
 0x1d3   : > { %v1378_v27 = vpop.f32.mrf.mxu3  ;;  %v1068_v4 = vpop.f32.mrf.mxu1 }
 0x1d4   : > { %1604 = vst [vmem:[%s2756_s27 + $0x68] sm:$0xff] %v1588_v20  ;;  %v1397_v37 = vadd.f32 %v1378_v27, %v1241_v21  ;;  %v1086_v24 = vadd.f32 %v1068_v4, %v2743_v52 }
 0x1d5   : > { %v1536_v28 = vpop.f32.mrf.mxu0 }
 0x1d6   : > { %v1553_v23 = vadd.f32 %v1534_v22, %v1397_v37 }
 0x1d8   : > { %v1573_v36 = vadd.f32 %v2750_v2, %v1553_v23 }
 0x1d9   : > { %v1224_v25 = vpop.f32.mrf.mxu2 }
 0x1da   : > { %v1589_v39 = vmax.f32 %v1573_v36, 0.0  ;;  %v1242_v48 = vadd.f32 %v1224_v25, %v1086_v24 }
 0x1db   : > { %v1380_v26 = vpop.f32.mrf.mxu3 }
 0x1dc   : > { %1605 = vst [vmem:[%s2756_s27 + $0x70] sm:$0xff] %v1589_v39  ;;  %v1398_v47 = vadd.f32 %v1380_v26, %v1242_v48 }
 0x1de   : > { %v1554_v46 = vadd.f32 %v1536_v28, %v1398_v47 }
 0x1e0   : > { %v1574_v52 = vadd.f32 %v2750_v2, %v1554_v46 }
 0x1e2   : > { %v1590_v12 = vmax.f32 %v1574_v52, 0.0 }
 0x1e4   : > { %1606 = vst [vmem:[%s2756_s27 + $0x78] sm:$0xff] %v1590_v12 }
 0x1e5   : > { %2410 = shalt.err (!%p2407_p7)
}
 0x1e6   : > { %s2461_s19 = smov 128   ;;  %s2462_s20 = smov 8  }
 0x1e7   : > { %2264 = dma.vmem_to_hbm [thread:$0]  (%p2521_p5), %s1621_s4, 2048, %s1623_s5, %s1608_s6, %s2461_s19, %s2461_s19, %s2462_s20  }
 0x1e8 PF: > { %p2281_p8 = scmp.ge.s32.totalorder %s2453_s15, 2  ;;  %s1637_s24 = sand.u32 1, %s2441_s12  }
 0x1e9   : > { %s1638_s25 = scalar_lea.sflag [#allocation4], %s1637_s24 }
 0x1ea   : > { %p2274_p9 = pnand %p2281_p8, %p2525_p6 }
 0x1ec   : > { %p2275_p10 = pneg %p2274_p9 }
 0x1ee   : > { %2436 = dma.done.wait (%p2275_p10), %s1638_s25, 2048  }
 0x1ef   : > { %2438 = vsyncadd (%p2275_p10), %s1638_s25, 4294965248  ;;  %p15_p11 = scmp.ge.s32.totalorder %s2508_s18, 8   ;;  %s2845_s12 = smov %s2445_s13 }
 0x1f0   : > { %s2846_s13 = smov %s2449_s14  ;;  %s2847_s14 = smov %s2519_s21 }
 0x1f1   : > { %s2848_s15 = smov %s2508_s18  ;;  %17 = sbr.rel (!%p15_p11) target bundleno = 5 (0x5), region = 90 }
 0x1f6   :  { %1644 = vsyncpa [#allocation3], 1 }
 0x1f7   :  { %1646 = vsyncpa [#allocation3 + $0x1], 1 }
 0x1f8   :  { %1647 = vsyncpa [#allocation6], 1 }
 0x1f9   :  { %1648 = vsyncpa [#allocation4], 1 }
 0x1fa   :  { %1650 = vsyncpa [#allocation4 + $0x1], 1 }

</bundles_post_ra>
